<compile_context>
chip_gen: v5e
topology: v5e:2x2
jax: 0.10.0
libtpu: 0.0.40
codegen_flags: <defaults>
</compile_context>

<pallas_src>
import numpy as np
import jax
import jax.numpy as jnp
from jax.experimental import pallas as pl
from jax.experimental.pallas import tpu as pltpu

BN_EPS = 1e-5


# ---------------------------------------------------------------------------
# Fused Pallas kernel (single invocation, whole working set in VMEM)
# ---------------------------------------------------------------------------

def _make_local_attention_kernel(B, C, H, W, D, mid):
    L = H + W + D
    BC = B * C

    def kernel(x_ref, pool_ref, w1_ref, b1_ref, wdir_ref, exp_ref, o_ref):
        # x_ref   : (B*C, N)      f32   flattened volume, N = H*W*D (lane-dense)
        # pool_ref: (N, L)        bf16  columns = [H-pool | W-pool | D-pool] avg weights
        # w1_ref  : (B*mid, B*C)  bf16  block-diag conv_1x1 with eval-mode BN folded in
        # b1_ref  : (B*mid, L)    f32   folded BN shift, pre-broadcast over L
        # wdir_ref: (3*B*C, B*mid) bf16 stacked block-diag [F_h; F_w; F_d] weights
        # exp_ref : (D, N)        bf16  one-hot expansion of the last spatial axis
        # o_ref   : (B*C, N)      f32
        x = x_ref[...]                                                      # (BC, N) f32
        xb = x.astype(jnp.bfloat16)

        # directional average pooling for ALL batches in one MXU matmul -> (BC, L)
        y = jnp.dot(xb, pool_ref[...], preferred_element_type=jnp.float32)

        # conv_1x1 (+ folded BatchNorm) + ReLU, batched via block-diagonal weight
        z = jnp.dot(w1_ref[...], y.astype(jnp.bfloat16),
                    preferred_element_type=jnp.float32) + b1_ref[...]       # (B*mid, L)
        z = jnp.maximum(z, 0.0)

        # all three directional 1x1 convs in ONE matmul, ONE sigmoid
        s = jax.nn.sigmoid(
            jnp.dot(wdir_ref[...], z.astype(jnp.bfloat16),
                    preferred_element_type=jnp.float32))                    # (3*BC, L) f32

        s_h = s[0:BC,           0:H]                                        # (BC, H)
        s_w = s[BC:2 * BC,      H:H + W]                                    # (BC, W)
        s_d = s[2 * BC:3 * BC,  H + W:L]                                    # (BC, D)

        # torch expand_as semantics: all three gates broadcast along the last axis
        scale = s_h * s_w * s_d                                             # (BC, D) f32
        scale_full = jnp.dot(scale.astype(jnp.bfloat16), exp_ref[...],
                             preferred_element_type=jnp.float32)            # (BC, N)
        o_ref[...] = x * scale_full

    return kernel


# ---------------------------------------------------------------------------
# Constant matrices (built once on the host)
# ---------------------------------------------------------------------------

def _pool_matrix(H, W, D):
    """(N, H+W+D) bf16: x2 @ P == concat(mean over (W,D), mean over (H,D), mean over (H,W))."""
    N = H * W * D
    n = np.arange(N)
    h = n // (W * D)
    w = (n // D) % W
    d = n % D
    P = np.zeros((N, H + W + D), np.float32)
    P[n, h] = 1.0 / (W * D)
    P[n, H + w] = 1.0 / (H * D)
    P[n, H + W + d] = 1.0 / (H * W)
    return jnp.asarray(P, dtype=jnp.bfloat16)


def _expand_matrix(H, W, D):
    """(D, N) bf16 one-hot: scale @ Q broadcasts a per-(bc, d) gate over the full volume."""
    N = H * W * D
    n = np.arange(N)
    Q = np.zeros((D, N), np.float32)
    Q[n % D, n] = 1.0
    return jnp.asarray(Q, dtype=jnp.bfloat16)


# ---------------------------------------------------------------------------
# Wrapper
# ---------------------------------------------------------------------------

def local_attention_forward(params, x):
    """x: (B, C, H, W, D) float32. Returns (B, C, H, W, D) float32."""
    B, C, H, W, D = x.shape
    # The PyTorch module's expand_as only works when H == W == D.
    assert H == W == D, "local_attention requires a cubic volume (H == W == D)"
    N = H * W * D
    L = H + W + D
    mid = params["w1"].shape[0]
    BC = B * C

    # Fold eval-mode BatchNorm3d into the (bias-free) conv_1x1.
    bn_scale = params["bn_gamma"] / jnp.sqrt(params["bn_rv"] + BN_EPS)
    w1f = params["w1"] * bn_scale[:, None]                        # (mid, C) f32
    b1f = params["bn_beta"] - params["bn_rm"] * bn_scale          # (mid,)   f32

    # Block-diagonal (over batch) weights so the whole batch shares one matmul each.
    eye_b = jnp.eye(B, dtype=jnp.float32)
    w1_bd = jnp.kron(eye_b, w1f).astype(jnp.bfloat16)             # (B*mid, B*C)
    b1_bd = jnp.broadcast_to(jnp.tile(b1f, B)[:, None],
                             (B * mid, L)).astype(jnp.float32)    # (B*mid, L)
    wdir_bd = jnp.concatenate(
        [jnp.kron(eye_b, params["wh"]),
         jnp.kron(eye_b, params["ww"]),
         jnp.kron(eye_b, params["wd"])], axis=0).astype(jnp.bfloat16)  # (3*B*C, B*mid)

    pool = _pool_matrix(H, W, D)        # (N, L)  bf16
    expand = _expand_matrix(H, W, D)    # (D, N)  bf16

    x2 = x.reshape(BC, N)               # contiguous reshape (free)

    flops = (2 * BC * N * L                   # pooling matmul
             + 2 * (B * mid) * BC * L         # conv_1x1
             + 2 * (3 * BC) * (B * mid) * L   # stacked directional convs
             + 2 * BC * D * N                 # expand matmul
             + 4 * BC * N)                    # final elementwise gate (+ casts)
    bytes_accessed = (x2.size * 4 + BC * N * 4 + pool.size * 2 + w1_bd.size * 2
                      + b1_bd.size * 4 + wdir_bd.size * 2 + expand.size * 2)

    out = pl.pallas_call(
        _make_local_attention_kernel(B, C, H, W, D, mid),
        out_shape=jax.ShapeDtypeStruct((BC, N), jnp.float32),
        cost_estimate=pl.CostEstimate(flops=int(flops),
                                      transcendentals=int(3 * BC * L),
                                      bytes_accessed=int(bytes_accessed)),
    )(x2, pool, w1_bd, b1_bd, wdir_bd, expand)

    return out.reshape(B, C, H, W, D)


# ---------------------------------------------------------------------------
# Parameters (deterministic synthetic init, matching module shapes)
# ---------------------------------------------------------------------------

def init_params(key, channel, reduction=16):
    mid = channel // reduction
    ks = jax.random.split(key, 8)
    return dict(
        # Conv3d(channel, mid, 1, bias=False) -> (mid, channel)
        w1=0.2 * jax.random.normal(ks[0], (mid, channel), jnp.float32),
        # F_h / F_w / F_d: Conv3d(mid, channel, 1, bias=False) -> (channel, mid)
        wh=0.3 * jax.random.normal(ks[1], (channel, mid), jnp.float32),
        ww=0.3 * jax.random.normal(ks[2], (channel, mid), jnp.float32),
        wd=0.3 * jax.random.normal(ks[3], (channel, mid), jnp.float32),
        # BatchNorm3d(mid) — eval mode (running stats)
        bn_gamma=1.0 + 0.1 * jax.random.normal(ks[4], (mid,), jnp.float32),
        bn_beta=0.1 * jax.random.normal(ks[5], (mid,), jnp.float32),
        bn_rm=0.1 * jax.random.normal(ks[6], (mid,), jnp.float32),
        bn_rv=1.0 + 0.1 * jnp.abs(jax.random.normal(ks[7], (mid,), jnp.float32)),
    )


# ---------------------------------------------------------------------------
# Pure-JAX reference (same math as the PyTorch module in eval mode)
# ---------------------------------------------------------------------------

def reference_forward(params, x):
    B, C, H, W, D = x.shape
    x_h = x.mean(axis=(3, 4))                       # (B, C, H)
    x_w = x.mean(axis=(2, 4))                       # (B, C, W)
    x_d = x.mean(axis=(2, 3))                       # (B, C, D)
    y = jnp.concatenate([x_h, x_w, x_d], axis=-1)   # (B, C, H+W+D)

    z = jnp.einsum("mc,bcl->bml", params["w1"], y)  # conv_1x1 (no bias)
    inv = params["bn_gamma"] / jnp.sqrt(params["bn_rv"] + BN_EPS)
    z = (z - params["bn_rm"][:, None]) * inv[:, None] + params["bn_beta"][:, None]
    z = jax.nn.relu(z)

    z_h, z_w, z_d = z[..., :H], z[..., H:H + W], z[..., H + W:]
    s_h = jax.nn.sigmoid(jnp.einsum("cm,bml->bcl", params["wh"], z_h))   # (B, C, H)
    s_w = jax.nn.sigmoid(jnp.einsum("cm,bml->bcl", params["ww"], z_w))   # (B, C, W)
    s_d = jax.nn.sigmoid(jnp.einsum("cm,bml->bcl", params["wd"], z_d))   # (B, C, D)

    # expand_as in the PyTorch code broadcasts all three gates along the LAST axis.
    scale = s_h * s_w * s_d                          # (B, C, D)   (H == W == D)
    return x * scale[:, :, None, None, :]


# ---------------------------------------------------------------------------

if __name__ == "__main__":
    B, C, H, W, D = 2, 64, 8, 8, 8      # channel=64, reduction=16 -> mid=4 ; cubic volume
    reduction = 16

    key = jax.random.PRNGKey(0)
    kx, kp = jax.random.split(key)
    x = jax.random.normal(kx, (B, C, H, W, D), jnp.float32)
    params = init_params(kp, C, reduction)

    out = local_attention_forward(params, x)
    out = jax.block_until_ready(out)

    ref = reference_forward(params, x)
    assert out.shape == (B, C, H, W, D)
    np.testing.assert_allclose(np.asarray(out), np.asarray(ref), rtol=2e-2, atol=2e-2)

    print("KERNEL_OK")
</pallas_src>

<mosaic_0001>
module attributes {stable_mosaic.version = 11 : i64} {
  func.func @kernel(%arg0: memref<128x512xf32, #tpu.memory_space<vmem>>, %arg1: memref<512x24xbf16, #tpu.memory_space<vmem>>, %arg2: memref<8x128xbf16, #tpu.memory_space<vmem>>, %arg3: memref<8x24xf32, #tpu.memory_space<vmem>>, %arg4: memref<384x8xbf16, #tpu.memory_space<vmem>>, %arg5: memref<8x512xbf16, #tpu.memory_space<vmem>>, %arg6: memref<128x512xf32, #tpu.memory_space<vmem>>) attributes {dimension_semantics = [], scalar_prefetch = 0 : i64, scratch_operands = 0 : i64, tpu.core_type = #tpu.core_type<tc>} {
    %c0 = arith.constant 0 : index
    %c0_0 = arith.constant 0 : index
    %0 = vector.load %arg0[%c0, %c0_0] : memref<128x512xf32, #tpu.memory_space<vmem>>, vector<128x512xf32>
    %1 = arith.truncf %0 : vector<128x512xf32> to vector<128x512xbf16>
    %c0_1 = arith.constant 0 : index
    %c0_2 = arith.constant 0 : index
    %2 = vector.load %arg1[%c0_1, %c0_2] : memref<512x24xbf16, #tpu.memory_space<vmem>>, vector<512x24xbf16>
    %cst = arith.constant dense<0.000000e+00> : vector<128x24xf32>
    %3 = tpu.matmul %1, %2, %cst {dimension_numbers = #tpu.dot_dimension_numbers<[1], [0], [0], [1], [0, 0, 1, 1], [], []>} : vector<128x512xbf16>, vector<512x24xbf16>, vector<128x24xf32> -> vector<128x24xf32>
    %c0_3 = arith.constant 0 : index
    %c0_4 = arith.constant 0 : index
    %4 = vector.load %arg2[%c0_3, %c0_4] : memref<8x128xbf16, #tpu.memory_space<vmem>>, vector<8x128xbf16>
    %5 = arith.truncf %3 : vector<128x24xf32> to vector<128x24xbf16>
    %cst_5 = arith.constant dense<0.000000e+00> : vector<8x24xf32>
    %6 = tpu.matmul %4, %5, %cst_5 {dimension_numbers = #tpu.dot_dimension_numbers<[1], [0], [0], [1], [0, 0, 1, 1], [], []>} : vector<8x128xbf16>, vector<128x24xbf16>, vector<8x24xf32> -> vector<8x24xf32>
    %c0_6 = arith.constant 0 : index
    %c0_7 = arith.constant 0 : index
    %7 = vector.load %arg3[%c0_6, %c0_7] : memref<8x24xf32, #tpu.memory_space<vmem>>, vector<8x24xf32>
    %8 = arith.addf %6, %7 : vector<8x24xf32>
    %cst_8 = arith.constant 0.000000e+00 : f32
    %9 = vector.broadcast %cst_8 : f32 to vector<8x24xf32>
    %10 = arith.maximumf %8, %9 : vector<8x24xf32>
    %c0_9 = arith.constant 0 : index
    %c0_10 = arith.constant 0 : index
    %11 = vector.load %arg4[%c0_9, %c0_10] : memref<384x8xbf16, #tpu.memory_space<vmem>>, vector<384x8xbf16>
    %12 = arith.truncf %10 : vector<8x24xf32> to vector<8x24xbf16>
    %cst_11 = arith.constant dense<0.000000e+00> : vector<384x24xf32>
    %13 = tpu.matmul %11, %12, %cst_11 {dimension_numbers = #tpu.dot_dimension_numbers<[1], [0], [0], [1], [0, 0, 1, 1], [], []>} : vector<384x8xbf16>, vector<8x24xbf16>, vector<384x24xf32> -> vector<384x24xf32>
    %14 = arith.negf %13 : vector<384x24xf32>
    %15 = math.exp %14 : vector<384x24xf32>
    %cst_12 = arith.constant 1.000000e+00 : f32
    %16 = vector.broadcast %cst_12 : f32 to vector<384x24xf32>
    %17 = arith.addf %16, %15 : vector<384x24xf32>
    %18 = arith.divf %16, %17 : vector<384x24xf32>
    %19 = vector.extract_strided_slice %18 {offsets = [0, 0], sizes = [128, 8], strides = [1, 1]} : vector<384x24xf32> to vector<128x8xf32>
    %20 = vector.extract_strided_slice %18 {offsets = [128, 8], sizes = [128, 8], strides = [1, 1]} : vector<384x24xf32> to vector<128x8xf32>
    %21 = vector.extract_strided_slice %18 {offsets = [256, 16], sizes = [128, 8], strides = [1, 1]} : vector<384x24xf32> to vector<128x8xf32>
    %22 = arith.mulf %19, %20 : vector<128x8xf32>
    %23 = arith.mulf %22, %21 : vector<128x8xf32>
    %24 = arith.truncf %23 : vector<128x8xf32> to vector<128x8xbf16>
    %c0_13 = arith.constant 0 : index
    %c0_14 = arith.constant 0 : index
    %25 = vector.load %arg5[%c0_13, %c0_14] : memref<8x512xbf16, #tpu.memory_space<vmem>>, vector<8x512xbf16>
    %cst_15 = arith.constant dense<0.000000e+00> : vector<128x512xf32>
    %26 = tpu.matmul %24, %25, %cst_15 {dimension_numbers = #tpu.dot_dimension_numbers<[1], [0], [0], [1], [0, 0, 1, 1], [], []>} : vector<128x8xbf16>, vector<8x512xbf16>, vector<128x512xf32> -> vector<128x512xf32>
    %27 = arith.mulf %0, %26 : vector<128x512xf32>
    %c0_16 = arith.constant 0 : index
    %c0_17 = arith.constant 0 : index
    %28 = vector.load %arg6[%c0_16, %c0_17] : memref<128x512xf32, #tpu.memory_space<vmem>>, vector<128x512xf32>
    tpu.vector_store %arg6[%c0_16, %c0_17], %27 {strides = array<i32>} : memref<128x512xf32, #tpu.memory_space<vmem>>, vector<128x512xf32>,
    return
  }
}

</mosaic_0001>

<bundles_post_ra>
// kernel: tpu_custom_call.1
= control target key start
LH: loop header
LB: loop body
LE: loop exit
PB: predicated region body
PF: predicated region fallthrough
CT: control target
= control target key end

     0   :  { %11 = vsyncpa [#allocation3], 0  ;;  %s4371_s0 = inlined_call_operand.hbm [shape: f32[128,512], index: 0, kind: input, shape index: {}]   ;;  %s4372_s1 = inlined_call_operand.vmem [shape: bf16[512,24], index: 1, kind: input, shape index: {}]   ;;  %s4373_s2 = inlined_call_operand.vmem [shape: bf16[8,128], index: 2, kind: input, shape index: {}]   ;;  %s4374_s3 = inlined_call_operand.vmem [shape: f32[8,24], index: 3, kind: input, shape index: {}]   ;;  %s4375_s4 = inlined_call_operand.vmem [shape: bf16[384,8], index: 4, kind: input, shape index: {}]   ;;  %s4376_s5 = inlined_call_operand.vmem [shape: bf16[8,512], index: 5, kind: input, shape index: {}]   ;;  %s4377_s6 = inlined_call_operand.hbm [shape: f32[128,512], index: 6, kind: output, shape index: {}]  }
   0x1   :  { %12 = vsyncpa [#allocation4], 0  ;;  %s17_s23 = sshll.u32 %s4371_s0, 4  ;;  %s3173_s24 = smov [#allocation2]   ;;  %s18_s23 = int_to_ptr.hbm [resolvable:$true] %s17_s23 }
   0x2   :  { %s19_s25 = sshll.u32 %s3173_s24, 4  ;;  %s3174_s26 = smov 512   ;;  %s20_s25 = int_to_ptr.vmem [resolvable:$true] %s19_s25 }
   0x3   :  { %s3175_s27 = smov 32  }
   0x4   :  { %25 = dma.hbm_to_vmem [thread:$0]  %s18_s23, 8192, %s20_s25, [#allocation3], %s3174_s26, %s3174_s26, %s3175_s27  }
   0x5   :  { %3169 = dma.done.wait [#allocation3], 8192  }
   0x6   :  { %3170 = vsyncadd [#allocation3], 4294959104  ;;  %v2794_v0 = vld [vmem:[%s4372_s1 + $0x38] sm:$0xff]  ;;  %v2793_v2 = vld [vmem:[%s4372_s1 + $0x30] sm:$0xff]  ;;  %vm855_vm0 = vcmask 1043456   ;;  %vm782_vm1 = vcmask 64512  }
   0x7   :  { %v2802_v1 = vld [vmem:[%s4372_s1 + $0x78] sm:$0xff]  ;;  %393 = vmatpush.bf16.msra.mxu0 %v2794_v0  ;;  %v2801_v3 = vld [vmem:[%s4372_s1 + $0x70] sm:$0xff]  ;;  %v2792_v5 = vld [vmem:[%s4372_s1 + $0x28] sm:$0xff]  ;;  %s3176_s9 = smov 120  }
   0x8   :  { %2843 = vmatpush.bf16.msra.mxu3 %v2802_v1  ;;  %v3235_v4 = vld [vmem:[%s4372_s1 + $0xb8] sm:$0xff]  ;;  %v2800_v6 = vld [vmem:[%s4372_s1 + $0x68] sm:$0xff]  ;;  %v3247_v7 = vld [vmem:[%s4372_s1 + $0xb0] sm:$0xff] }
   0x9   :  { %2851 = vmatpush.bf16.msra.mxu2 %v3235_v4  ;;  %v2791_v8 = vld [vmem:[%s4372_s1 + $0x20] sm:$0xff]  ;;  %v3259_v10 = vld [vmem:[%s4372_s1 + $0xa8] sm:$0xff]  ;;  %v2790_v11 = vld [vmem:[%s4372_s1 + $0x18] sm:$0xff] }
   0xa   :  { %v2799_v9 = vld [vmem:[%s4372_s1 + $0x60] sm:$0xff]  ;;  %v2798_v12 = vld [vmem:[%s4372_s1 + $0x58] sm:$0xff]  ;;  %v2789_v14 = vld [vmem:[%s4372_s1 + $0x10] sm:$0xff] }
   0xb   :  { %394 = vmatpush.bf16.msra.mxu0 %v2793_v2  ;;  %v3271_v13 = vld [vmem:[%s4372_s1 + $0xa0] sm:$0xff]  ;;  %v2797_v15 = vld [vmem:[%s4372_s1 + $0x50] sm:$0xff]  ;;  %v3283_v16 = vld [vmem:[%s4372_s1 + $0x98] sm:$0xff] }
   0xc   :  { %2844 = vmatpush.bf16.msra.mxu3 %v2801_v3  ;;  %v2788_v17 = vld [vmem:[%s4372_s1 + $0x8] sm:$0xff]  ;;  %v3295_v19 = vld [vmem:[%s4372_s1 + $0x90] sm:$0xff]  ;;  %v2787_v20 = vld [vmem:[%s4372_s1] sm:$0xff] }
   0xd   :  { %2852 = vmatpush.bf16.msra.mxu2 %v3247_v7  ;;  %v2796_v18 = vld [vmem:[%s4372_s1 + $0x48] sm:$0xff]  ;;  %v2795_v21 = vld [vmem:[%s4372_s1 + $0x40] sm:$0xff]  ;;  %v2818_v26 = vld [vmem:[%s4372_s1 + $0xf8] sm:$0xff] }
   0xe   :  { %v41_v22 = vld [vmem:[#allocation2] sm:$0xff]  ;;  %v58_v24 = vld [vmem:[#allocation2 + $0x88] sm:$0xff]  ;;  %v2817_v30 = vld [vmem:[%s4372_s1 + $0xf0] sm:$0xff] }
   0xf   :  { %395 = vmatpush.bf16.msra.mxu0 %v2792_v5  ;;  %v45_v23 = vld [vmem:[#allocation2 + $0x20] sm:$0xff]  ;;  %v62_v25 = vld [vmem:[#allocation2 + $0xa8] sm:$0xff]  ;;  %v59_v32 = vld [vmem:[#allocation2 + $0x90] sm:$0xff] }
  0x10   :  { %2845 = vmatpush.bf16.msra.mxu3 %v2800_v6  ;;  %v3310_v27 = vld [vmem:[%s4372_s1 + $0x88] sm:$0xff]  ;;  %v105_v28 = vpack.c.bf16 %v45_v23, %v41_v22  ;;  %v114_v29 = vpack.c.bf16 %v62_v25, %v58_v24  ;;  %v3319_v31 = vld [vmem:[%s4372_s1 + $0x80] sm:$0xff]  ;;  %v63_v33 = vld [vmem:[#allocation2 + $0xb0] sm:$0xff] }
  0x11   :  { %2853 = vmatpush.bf16.msra.mxu2 %v3259_v10  ;;  %v115_v34 = vpack.c.bf16 %v63_v33, %v59_v32  ;;  %v2816_v35 = vld [vmem:[%s4372_s1 + $0xe8] sm:$0xff]  ;;  %v2815_v36 = vld [vmem:[%s4372_s1 + $0xe0] sm:$0xff]  ;;  %v67_v43 = vld [vmem:[#allocation2 + $0xd0] sm:$0xff] }
  0x12   :  { %v49_v37 = vld [vmem:[#allocation2 + $0x40] sm:$0xff]  ;;  %v66_v39 = vld [vmem:[#allocation2 + $0xc8] sm:$0xff]  ;;  %v71_v44 = vld [vmem:[#allocation2 + $0xf0] sm:$0xff] }
  0x13   :  { %396 = vmatpush.bf16.msra.mxu0 %v2791_v8  ;;  %v53_v38 = vld [vmem:[#allocation2 + $0x60] sm:$0xff]  ;;  %v70_v40 = vld [vmem:[#allocation2 + $0xe8] sm:$0xff]  ;;  %v2814_v45 = vld [vmem:[%s4372_s1 + $0xd8] sm:$0xff]  ;;  %v119_v46 = vpack.c.bf16 %v71_v44, %v67_v43 }
  0x14   :  { %2846 = vmatpush.bf16.msra.mxu3 %v2799_v9  ;;  %v109_v41 = vpack.c.bf16 %v53_v38, %v49_v37  ;;  %v118_v42 = vpack.c.bf16 %v70_v40, %v66_v39  ;;  %v2813_v47 = vld [vmem:[%s4372_s1 + $0xd0] sm:$0xff]  ;;  %v57_v48 = vld [vmem:[#allocation2 + $0x80] sm:$0xff]  ;;  %v74_v50 = vld [vmem:[#allocation2 + $0x108] sm:$0xff] }
  0x15   :  { %2854 = vmatpush.bf16.msra.mxu2 %v3271_v13  ;;  %v61_v49 = vld [vmem:[#allocation2 + $0xa0] sm:$0xff]  ;;  %v78_v51 = vld [vmem:[#allocation2 + $0x128] sm:$0xff]  ;;  %v75_v54 = vld [vmem:[#allocation2 + $0x110] sm:$0xff] }
  0x16   :  { %v113_v52 = vpack.c.bf16 %v61_v49, %v57_v48  ;;  %v122_v53 = vpack.c.bf16 %v78_v51, %v74_v50  ;;  %v79_v55 = vld [vmem:[#allocation2 + $0x130] sm:$0xff]  ;;  %v2812_v56 = vld [vmem:[%s4372_s1 + $0xc8] sm:$0xff]  ;;  %v65_v58 = vld [vmem:[#allocation2 + $0xc0] sm:$0xff] }
  0x17   :  { %397 = vmatpush.bf16.msra.mxu0 %v2790_v11  ;;  %v123_v57 = vpack.c.bf16 %v79_v55, %v75_v54  ;;  %v69_v59 = vld [vmem:[#allocation2 + $0xe0] sm:$0xff]  ;;  %v82_v60 = vld [vmem:[#allocation2 + $0x148] sm:$0xff]  ;;  %v83_v0 = vld [vmem:[#allocation2 + $0x150] sm:$0xff] }
  0x18   :  { %2847 = vmatpush.bf16.msra.mxu3 %v2798_v12  ;;  %v86_v61 = vld [vmem:[#allocation2 + $0x168] sm:$0xff]  ;;  %v117_v62 = vpack.c.bf16 %v69_v59, %v65_v58  ;;  %v2811_v2 = vld [vmem:[%s4372_s1 + $0xc0] sm:$0xff]  ;;  %v95_v11 = vld [vmem:[#allocation2 + $0x1b0] sm:$0xff] }
  0x19   :  { %2855 = vmatpush.bf16.msra.mxu2 %v3283_v16  ;;  %v126_v63 = vpack.c.bf16 %v86_v61, %v82_v60  ;;  %v77_v5 = vld [vmem:[#allocation2 + $0x120] sm:$0xff]  ;;  %v44_v24 = vld [vmem:[#allocation2 + $0x18] sm:$0xff]  ;;  %v50_v43 = vld [vmem:[#allocation2 + $0x48] sm:$0xff] }
  0x1a   :  { %v89_v22 = vld [vmem:[#allocation2 + $0x180] sm:$0xff]  ;;  %v48_v25 = vld [vmem:[#allocation2 + $0x38] sm:$0xff]  ;;  %v54_v44 = vld [vmem:[#allocation2 + $0x68] sm:$0xff] }
  0x1b   :  { %398 = vmatpush.bf16.msra.mxu0 %v2789_v14  ;;  %v85_v14 = vld [vmem:[#allocation2 + $0x160] sm:$0xff]  ;;  %v64_v37 = vld [vmem:[#allocation2 + $0xb8] sm:$0xff]  ;;  %v110_v48 = vpack.c.bf16 %v54_v44, %v50_v43  ;;  %v43_v54 = vld [vmem:[#allocation2 + $0x10] sm:$0xff] }
  0x1c   :  { %2848 = vmatpush.bf16.msra.mxu3 %v2797_v15  ;;  %v93_v23 = vld [vmem:[#allocation2 + $0x1a0] sm:$0xff]  ;;  %v47_v55 = vld [vmem:[#allocation2 + $0x30] sm:$0xff] }
  0x1d   :  { %2856 = vmatpush.bf16.msra.mxu2 %v3295_v19  ;;  %v107_v59 = vpack.c.bf16 %v47_v55, %v43_v54 }
  0x1f   :  { %399 = vmatpush.bf16.msra.mxu0 %v2788_v17 }
  0x20   :  { %2849 = vmatpush.bf16.msra.mxu3 %v2796_v18 }
  0x21   :  { %2857 = vmatpush.bf16.msra.mxu2 %v3310_v27 }
  0x23   :  { %400 = vmatpush.bf16.msra.mxu0 %v2787_v20  ;;  %v103_v20 = vld [vmem:[#allocation2 + $0x1f0] sm:$0xff] }
  0x24   :  { %2850 = vmatpush.bf16.msra.mxu3 %v2795_v21 }
  0x25   :  { %2858 = vmatpush.bf16.msra.mxu2 %v3319_v31 }
  0x26   :  { %401 = vmatmul.bf16.vlgmr.msra.gmra.mxu0 %v105_v28  ;;  %v97_v28 = vld [vmem:[#allocation2 + $0x1c0] sm:$0xff] }
  0x27   :  { %442 = vmatpush.bf16.msrb.mxu0 %v2802_v1  ;;  %460 = vmatmul.bf16.vlgmr.msra.gmra.mxu3 %v114_v29  ;;  %v87_v1 = vld [vmem:[#allocation2 + $0x170] sm:$0xff]  ;;  %v101_v29 = vld [vmem:[#allocation2 + $0x1e0] sm:$0xff] }
  0x28   :  { %540 = vmatpush.bf16.msrb.mxu3 %v2818_v26  ;;  %509 = vmatmul.bf16.vlgmr.msra.gmra.mxu2 %v115_v34  ;;  %v129_v26 = vpack.c.bf16 %v93_v23, %v89_v22  ;;  %v133_v32 = vpack.c.bf16 %v101_v29, %v97_v28  ;;  %v42_v34 = vld [vmem:[#allocation2 + $0x8] sm:$0xff]  ;;  %v104_v28 = vld [vmem:[#allocation2 + $0x1f8] sm:$0xff] }
  0x2b   :  { %443 = vmatpush.bf16.msrb.mxu0 %v2801_v3  ;;  %v127_v3 = vpack.c.bf16 %v87_v1, %v83_v0 }
  0x2c   :  { %541 = vmatpush.bf16.msrb.mxu3 %v2817_v30  ;;  %v52_v30 = vld [vmem:[#allocation2 + $0x58] sm:$0xff] }
  0x2f   :  { %444 = vmatpush.bf16.msrb.mxu0 %v2800_v6  ;;  %v90_v6 = vld [vmem:[#allocation2 + $0x188] sm:$0xff] }
  0x30   :  { %542 = vmatpush.bf16.msrb.mxu3 %v2816_v35  ;;  %v46_v35 = vld [vmem:[#allocation2 + $0x28] sm:$0xff] }
  0x31   :  { %v106_v38 = vpack.c.bf16 %v46_v35, %v42_v34 }
  0x33   :  { %445 = vmatpush.bf16.msrb.mxu0 %v2799_v9 }
  0x34   :  { %543 = vmatpush.bf16.msrb.mxu3 %v2815_v36  ;;  %v60_v36 = vld [vmem:[#allocation2 + $0x98] sm:$0xff] }
  0x35   :  { %v116_v39 = vpack.c.bf16 %v64_v37, %v60_v36 }
  0x36   :  { %406 = vmatmul.bf16.gmra.mxu0 %v109_v41 }
  0x37   :  { %446 = vmatpush.bf16.msrb.mxu0 %v2798_v12  ;;  %465 = vmatmul.bf16.gmra.mxu3 %v118_v42 }
  0x38   :  { %544 = vmatpush.bf16.msrb.mxu3 %v2814_v45  ;;  %514 = vmatmul.bf16.gmra.mxu2 %v119_v46  ;;  %v68_v45 = vld [vmem:[#allocation2 + $0xd8] sm:$0xff] }
  0x39   :  { %v72_v46 = vld [vmem:[#allocation2 + $0xf8] sm:$0xff] }
  0x3a   :  { %v120_v49 = vpack.c.bf16 %v72_v46, %v68_v45 }
  0x3b   :  { %447 = vmatpush.bf16.msrb.mxu0 %v2797_v15  ;;  %v98_v15 = vld [vmem:[#allocation2 + $0x1c8] sm:$0xff] }
  0x3c   :  { %545 = vmatpush.bf16.msrb.mxu3 %v2813_v47 }
  0x3f   :  { %448 = vmatpush.bf16.msrb.mxu0 %v2796_v18 }
  0x40   :  { %546 = vmatpush.bf16.msrb.mxu3 %v2812_v56  ;;  %v76_v56 = vld [vmem:[#allocation2 + $0x118] sm:$0xff] }
  0x43   :  { %449 = vmatpush.bf16.msrb.mxu0 %v2795_v21 }
  0x44   :  { %547 = vmatpush.bf16.msrb.mxu3 %v2811_v2 }
  0x46   :  { %411 = vmatmul.bf16.gmra.mxu0 %v113_v52 }
  0x47   :  { %491 = vmatpush.bf16.msra.mxu0 %v3235_v4  ;;  %470 = vmatmul.bf16.gmra.mxu3 %v122_v53  ;;  %v73_v4 = vld [vmem:[#allocation2 + $0x100] sm:$0xff] }
  0x48   :  { %519 = vmatmul.bf16.gmra.mxu2 %v123_v57  ;;  %v121_v8 = vpack.c.bf16 %v77_v5, %v73_v4  ;;  %v80_v57 = vld [vmem:[#allocation2 + $0x138] sm:$0xff]  ;;  %v55_v5 = vld [vmem:[#allocation2 + $0x70] sm:$0xff] }
  0x49   :  { %v124_v60 = vpack.c.bf16 %v80_v57, %v76_v56 }
  0x4b   :  { %492 = vmatpush.bf16.msra.mxu0 %v3247_v7  ;;  %v94_v7 = vld [vmem:[#allocation2 + $0x1a8] sm:$0xff] }
  0x4c   :  { %v130_v9 = vpack.c.bf16 %v94_v7, %v90_v6  ;;  %v84_v6 = vld [vmem:[#allocation2 + $0x158] sm:$0xff] }
  0x4d   :  { %v88_v7 = vld [vmem:[#allocation2 + $0x178] sm:$0xff] }
  0x4f   :  { %493 = vmatpush.bf16.msra.mxu0 %v3259_v10  ;;  %v91_v10 = vld [vmem:[#allocation2 + $0x190] sm:$0xff] }
  0x50   :  { %v131_v12 = vpack.c.bf16 %v95_v11, %v91_v10  ;;  %v128_v10 = vpack.c.bf16 %v88_v7, %v84_v6 }
  0x53   :  { %494 = vmatpush.bf16.msra.mxu0 %v3271_v13  ;;  %v81_v13 = vld [vmem:[#allocation2 + $0x140] sm:$0xff] }
  0x54   :  { %v125_v17 = vpack.c.bf16 %v85_v14, %v81_v13 }
  0x56   :  { %416 = vmatmul.bf16.gmra.mxu0 %v117_v62 }
  0x57   :  { %495 = vmatpush.bf16.msra.mxu0 %v3283_v16  ;;  %475 = vmatmul.bf16.gmra.mxu3 %v126_v63  ;;  %v102_v16 = vld [vmem:[#allocation2 + $0x1e8] sm:$0xff] }
  0x58   :  { %524 = vmatmul.bf16.gmra.mxu2 %v127_v3  ;;  %v134_v18 = vpack.c.bf16 %v102_v16, %v98_v15  ;;  %v51_v3 = vld [vmem:[#allocation2 + $0x50] sm:$0xff] }
  0x5b   :  { %496 = vmatpush.bf16.msra.mxu0 %v3295_v19  ;;  %v99_v19 = vld [vmem:[#allocation2 + $0x1d0] sm:$0xff] }
  0x5c   :  { %v135_v21 = vpack.c.bf16 %v103_v20, %v99_v19 }
  0x5f   :  { %497 = vmatpush.bf16.msra.mxu0 %v3310_v27  ;;  %v108_v27 = vpack.c.bf16 %v48_v25, %v44_v24 }
  0x63   :  { %498 = vmatpush.bf16.msra.mxu0 %v3319_v31  ;;  %v56_v31 = vld [vmem:[#allocation2 + $0x78] sm:$0xff] }
  0x64   :  { %v112_v33 = vpack.c.bf16 %v56_v31, %v52_v30 }
  0x66   :  { %421 = vmatmul.bf16.gmra.mxu0 %v121_v8 }
  0x67   :  { %480 = vmatmul.bf16.gmra.mxu3 %v130_v9  ;;  %v111_v9 = vpack.c.bf16 %v55_v5, %v51_v3 }
  0x68   :  { %529 = vmatmul.bf16.gmra.mxu2 %v131_v12 }
  0x76   :  { %426 = vmatmul.bf16.gmra.mxu0 %v125_v17  ;;  %v92_v17 = vld [vmem:[#allocation2 + $0x198] sm:$0xff] }
  0x77   :  { %485 = vmatmul.bf16.gmra.mxu3 %v134_v18  ;;  %v96_v18 = vld [vmem:[#allocation2 + $0x1b8] sm:$0xff] }
  0x78   :  { %534 = vmatmul.bf16.gmra.mxu2 %v135_v21  ;;  %v132_v20 = vpack.c.bf16 %v96_v18, %v92_v17 }
  0x86   :  { %431 = vmatmul.bf16.gmra.mxu0 %v129_v26 }
  0x87   :  { %548 = vmatmul.bf16.vlgmr.msrb.gmra.mxu3 %v108_v27  ;;  %v100_v27 = vld [vmem:[#allocation2 + $0x1d8] sm:$0xff] }
  0x88   :  { %v136_v30 = vpack.c.bf16 %v104_v28, %v100_v27 }
  0x96   :  { %436 = vmatmul.bf16.gmra.mxu0 %v133_v32 }
  0x97   :  { %553 = vmatmul.bf16.gmra.mxu3 %v112_v33 }
  0xa3   :  { %v3348_v40 = vpop.f32.mrf.mxu0 }
  0xa6   :  { %450 = vmatmul.bf16.vlgmr.msrb.gmra.mxu0 %v106_v38 }
  0xa7   :  { %558 = vmatmul.bf16.gmra.mxu3 %v116_v39 }
  0xaa   :  { %v461_v41 = vpop.f32.mrf.mxu3 }
  0xab   :  { %v3350_v42 = vpop.f32.mrf.mxu0  ;;  %v510_v53 = vpop.f32.mrf.mxu2 }
  0xb2   :  { %v3352_v47 = vpop.f32.mrf.mxu3 }
  0xb3   :  { %v3354_v50 = vpop.f32.mrf.mxu0  ;;  %v512_v63 = vpop.f32.mrf.mxu2 }
  0xb6   :  { %455 = vmatmul.bf16.gmra.mxu0 %v110_v48 }
  0xb7   :  { %563 = vmatmul.bf16.gmra.mxu3 %v120_v49 }
  0xba   :  { %v466_v51 = vpop.f32.mrf.mxu3 }
  0xbb   :  { %v3356_v52 = vpop.f32.mrf.mxu0  ;;  %v515_v4 = vpop.f32.mrf.mxu2 }
  0xc2   :  { %v3358_v58 = vpop.f32.mrf.mxu3 }
  0xc3   :  { %v412_v61 = vpop.f32.mrf.mxu0  ;;  %v517_v15 = vpop.f32.mrf.mxu2 }
  0xc4   :  { %v462_v62 = vadd.f32 %v461_v41, %v412_v61 }
  0xc6   :  { %v511_v0 = vadd.f32 %v510_v53, %v462_v62  ;;  %499 = vmatmul.bf16.vlgmr.msra.gmra.mxu0 %v107_v59 }
  0xc7   :  { %568 = vmatmul.bf16.gmra.mxu3 %v124_v60 }
  0xca   :  { %v471_v1 = vpop.f32.mrf.mxu3 }
  0xcb   :  { %v414_v2 = vpop.f32.mrf.mxu0  ;;  %v520_v22 = vpop.f32.mrf.mxu2 }
  0xcc   :  { %v464_v46 = vadd.f32 %v3352_v47, %v414_v2 }
  0xce   :  { %v513_v49 = vadd.f32 %v512_v63, %v464_v46 }
  0xd2   :  { %v3360_v8 = vpop.f32.mrf.mxu3 }
  0xd3   :  { %v417_v11 = vpop.f32.mrf.mxu0  ;;  %v522_v61 = vpop.f32.mrf.mxu2 }
  0xd4   :  { %v467_v12 = vadd.f32 %v466_v51, %v417_v11 }
  0xd6   :  { %v516_v13 = vadd.f32 %v515_v4, %v467_v12  ;;  %504 = vmatmul.bf16.gmra.mxu0 %v111_v9 }
  0xd7   :  { %573 = vmatmul.bf16.gmra.mxu3 %v128_v10 }
  0xda   :  { %v476_v14 = vpop.f32.mrf.mxu3 }
  0xdb   :  { %v419_v16 = vpop.f32.mrf.mxu0  ;;  %v525_v2 = vpop.f32.mrf.mxu2 }
  0xdc   :  { %v469_v59 = vadd.f32 %v3358_v58, %v419_v16 }
  0xde   :  { %v518_v60 = vadd.f32 %v517_v15, %v469_v59 }
  0xe2   :  { %v3362_v19 = vpop.f32.mrf.mxu3 }
  0xe3   :  { %v422_v21 = vpop.f32.mrf.mxu0  ;;  %v527_v6 = vpop.f32.mrf.mxu2 }
  0xe4   :  { %v472_v23 = vadd.f32 %v471_v1, %v422_v21 }
  0xe6   :  { %v521_v24 = vadd.f32 %v520_v22, %v472_v23 }
  0xe7   :  { %578 = vmatmul.bf16.gmra.mxu3 %v132_v20 }
  0xea   :  { %v481_v25 = vpop.f32.mrf.mxu3 }
  0xeb   :  { %v3364_v26 = vpop.f32.mrf.mxu0  ;;  %v530_v10 = vpop.f32.mrf.mxu2 }
  0xf2   :  { %v483_v29 = vpop.f32.mrf.mxu3 }
  0xf3   :  { %v427_v31 = vpop.f32.mrf.mxu0 }
  0xf4   :  { %v3366_v32 = vadd.f32 %v476_v14, %v427_v31 }
  0xf7   :  { %583 = vmatmul.bf16.gmra.mxu3 %v136_v30 }
  0xfa   :  { %v486_v33 = vpop.f32.mrf.mxu3 }
  0xfb   :  { %v429_v34 = vpop.f32.mrf.mxu0 }
  0xfc   :  { %v479_v30 = vadd.f32 %v3362_v19, %v429_v34 }
 0x102   :  { %v488_v35 = vpop.f32.mrf.mxu3 }
 0x103   :  { %v432_v36 = vpop.f32.mrf.mxu0 }
 0x104   :  { %v482_v37 = vadd.f32 %v481_v25, %v432_v36 }
 0x106   :  { %v531_v46 = vadd.f32 %v530_v10, %v482_v37  ;;  %v2823_v10 = vld [vmem:[%s4375_s4 + $0x20] sm:$0xff] }
 0x10a   :  { %v3368_v38 = vpop.f32.mrf.mxu3 }
 0x10b   :  { %v434_v48 = vpop.f32.mrf.mxu0 }
 0x112   :  { %v3370_v39 = vpop.f32.mrf.mxu3 }
 0x113   :  { %v437_v55 = vpop.f32.mrf.mxu0 }
 0x114   :  { %v487_v20 = vadd.f32 %v486_v33, %v437_v55 }
 0x11a   :  { %v3372_v41 = vpop.f32.mrf.mxu3 }
 0x11b   :  { %v439_v62 = vpop.f32.mrf.mxu0 }
 0x11c   :  { %v489_v21 = vadd.f32 %v488_v35, %v439_v62 }
 0x122   :  { %v3374_v43 = vpop.f32.mrf.mxu3 }
 0x123   :  { %v451_v4 = vpop.f32.mrf.mxu0 }
 0x12a   :  { %v559_v44 = vpop.f32.mrf.mxu3 }
 0x12b   :  { %v3376_v45 = vadd.f32 %v559_v44, %v511_v0  ;;  %v453_v7 = vpop.f32.mrf.mxu0 }
 0x132   :  { %v561_v51 = vpop.f32.mrf.mxu3 }
 0x133   :  { %v3379_v53 = vadd.f32 %v561_v51, %v513_v49  ;;  %v456_v11 = vpop.f32.mrf.mxu0 }
 0x135   :  { %v592_v54 = vpack.c.bf16 %v3379_v53, %v3376_v45 }
 0x13a   :  { %v564_v56 = vpop.f32.mrf.mxu3 }
 0x13b   :  { %v3383_v57 = vadd.f32 %v564_v56, %v516_v13  ;;  %v532_v13 = vpop.f32.mrf.mxu2  ;;  %v458_v58 = vpop.f32.mrf.mxu0  ;;  %v474_v56 = vadd.f32 %v3360_v8, %v3364_v26  ;;  %v457_v8 = vadd.f32 %v456_v11, %v3354_v50  ;;  %v2824_v11 = vld [vmem:[%s4375_s4 + $0x28] sm:$0xff] }
 0x13d   :  { %v523_v59 = vadd.f32 %v522_v61, %v474_v56  ;;  %v2834_v56 = vld [vmem:[%s4375_s4 + $0x78] sm:$0xff] }
 0x142   :  { %v566_v0 = vpop.f32.mrf.mxu3 }
 0x143   :  { %v567_v1 = vadd.f32 %v566_v0, %v518_v60  ;;  %v535_v16 = vpop.f32.mrf.mxu2  ;;  %v500_v17 = vpop.f32.mrf.mxu0  ;;  %v459_v0 = vadd.f32 %v458_v58, %v3356_v52  ;;  %v2827_v58 = vld [vmem:[%s4375_s4 + $0x40] sm:$0xff] }
 0x144   :  { %v536_v25 = vadd.f32 %v535_v16, %v487_v20  ;;  %v2828_v16 = vld [vmem:[%s4375_s4 + $0x48] sm:$0xff]  ;;  %v2829_v20 = vld [vmem:[%s4375_s4 + $0x50] sm:$0xff] }
 0x145   :  { %v593_v47 = vpack.c.bf16 %v567_v1, %v3383_v57  ;;  %v528_v57 = vadd.f32 %v527_v6, %v479_v30  ;;  %v454_v1 = vadd.f32 %v453_v7, %v3350_v42  ;;  %v2821_v7 = vld [vmem:[%s4375_s4 + $0x10] sm:$0xff] }
 0x14a   :  { %v569_v63 = vpop.f32.mrf.mxu3 }
 0x14b   :  { %v570_v3 = vadd.f32 %v569_v63, %v521_v24  ;;  %v537_v22 = vpop.f32.mrf.mxu2  ;;  %v502_v23 = vpop.f32.mrf.mxu0  ;;  %v484_v24 = vadd.f32 %v483_v29, %v434_v48  ;;  %v526_v29 = vadd.f32 %v525_v2, %v3366_v32  ;;  %v452_v32 = vadd.f32 %v451_v4, %v3348_v40  ;;  %v589_v40 = vld [vmem:[%s4373_s2] sm:$0xf]  ;;  %v2820_v4 = vld [vmem:[%s4375_s4 + $0x8] sm:$0xff] }
 0x14c   :  { %v538_v27 = vadd.f32 %v537_v22, %v489_v21  ;;  %v503_v61 = vadd.f32 %v502_v23, %v454_v1  ;;  %v2830_v23 = vld [vmem:[%s4375_s4 + $0x58] sm:$0xff] }
 0x14d   :  { %v533_v31 = vadd.f32 %v532_v13, %v484_v24  ;;  %v2826_v13 = vld [vmem:[%s4375_s4 + $0x38] sm:$0xff] }
 0x14e   :  { %v552_v52 = vadd.f32 %v3370_v39, %v503_v61 }
 0x152   :  { %v571_v5 = vpop.f32.mrf.mxu3 }
 0x153   :  { %v505_v35 = vpop.f32.mrf.mxu0  ;;  %v572_v19 = vadd.f32 %v571_v5, %v523_v59  ;;  %v501_v5 = vadd.f32 %v500_v17, %v452_v32 }
 0x154   :  { %v506_v63 = vadd.f32 %v505_v35, %v457_v8  ;;  %v2835_v35 = vld [vmem:[%s4375_s4 + $0x80] sm:$0xff] }
 0x155   :  { %v594_v37 = vpack.c.bf16 %v572_v19, %v570_v3  ;;  %v550_v3 = vadd.f32 %v3368_v38, %v501_v5  ;;  %v2819_v38 = vld [vmem:[%s4375_s4] sm:$0xff] }
 0x156   :  { %v555_v6 = vadd.f32 %v3372_v41, %v506_v63  ;;  %v598_v41 = vld [vmem:[%s4374_s3] sm:$0xff]  ;;  %s2446_s3 = sshll.u32 %s4377_s6, 4  ;;  %s2447_s3 = int_to_ptr.hbm [resolvable:$true] %s2446_s3 }
 0x157   :  { %v590_v42 = vpack.c.bf16 %v552_v52, %v550_v3 }
 0x15a   :  { %v574_v9 = vpop.f32.mrf.mxu3 }
 0x15b   :  { %v575_v60 = vadd.f32 %v574_v9, %v526_v29  ;;  %v507_v62 = vpop.f32.mrf.mxu0  ;;  %v2822_v9 = vld [vmem:[%s4375_s4 + $0x18] sm:$0xff] }
 0x15c   :  { %v508_v26 = vadd.f32 %v507_v62, %v459_v0 }
 0x15e   :  { %v557_v2 = vadd.f32 %v3374_v43, %v508_v26 }
 0x160   :  { %v591_v50 = vpack.c.bf16 %v557_v2, %v555_v6 }
 0x162   :  { %v576_v12 = vpop.f32.mrf.mxu3 }
 0x163   :  { %v577_v48 = vadd.f32 %v576_v12, %v528_v57  ;;  %v2825_v12 = vld [vmem:[%s4375_s4 + $0x30] sm:$0xff] }
 0x165   :  { %v595_v34 = vpack.c.bf16 %v577_v48, %v575_v60 }
 0x16a   :  { %v579_v14 = vpop.f32.mrf.mxu3 }
 0x16b   :  { %v580_v33 = vadd.f32 %v579_v14, %v531_v46  ;;  %v2833_v46 = vld [vmem:[%s4375_s4 + $0x70] sm:$0xff] }
 0x172   :  { %v581_v15 = vpop.f32.mrf.mxu3 }
 0x173   :  { %v582_v49 = vadd.f32 %v581_v15, %v533_v31  ;;  %v2832_v31 = vld [vmem:[%s4375_s4 + $0x68] sm:$0xff] }
 0x175   :  { %v596_v55 = vpack.c.bf16 %v582_v49, %v580_v33 }
 0x17a   :  { %v584_v18 = vpop.f32.mrf.mxu3 }
 0x17b   :  { %v585_v36 = vadd.f32 %v584_v18, %v536_v25 }
 0x182   :  { %v586_v28 = vpop.f32.mrf.mxu3 }
 0x183   :  { %v587_v44 = vadd.f32 %v586_v28, %v538_v27  ;;  %v2831_v27 = vld [vmem:[%s4375_s4 + $0x60] sm:$0xff] }
 0x185   :  { %v597_v51 = vpack.c.bf16 %v587_v44, %v585_v36 }
 0x187   :  { %599 = vmatpush.bf16.msrb.mxu0 %v597_v51 }
 0x18b   :  { %600 = vmatpush.bf16.msrb.mxu0 %v596_v55 }
 0x18f   :  { %601 = vmatpush.bf16.msrb.mxu0 %v595_v34  ;;  %v2836_v34 = vld [vmem:[%s4375_s4 + $0x88] sm:$0xff] }
 0x193   :  { %602 = vmatpush.bf16.msrb.mxu0 %v594_v37 }
 0x197   :  { %603 = vmatpush.bf16.msrb.mxu0 %v593_v47 }
 0x19b   :  { %604 = vmatpush.bf16.msrb.mxu0 %v592_v54 }
 0x19f   :  { %605 = vmatpush.bf16.msrb.mxu0 %v591_v50 }
 0x1a3   :  { %606 = vmatpush.bf16.msrb.mxu0 %v590_v42 }
 0x1a6   :  { %607 = vmatmul.bf16.vlgmr.msrb.gmra.mxu0 %v589_v40 }
 0x223   :  { %v608_v43 = vpop.f32.mrf.mxu0 }
 0x224   :  { %v609_v45 = vadd.f32 %v608_v43, %v598_v41 }
 0x226   :  { %v612_v53 = vmax.f32 %v609_v45, 0.0 }
 0x228   :  { %v661_v39 = vpack.c.bf16 %v612_v53, %v612_v53 }
 0x22a   :  { %v857_v54 = vsel %vm855_vm0, %v661_v39, 0 }
 0x22b   :  { %v610_v47 = vpop.f32.mrf.mxu0  ;;  %866 = vmatpush.bf16.msra.mxu1 %v857_v54  ;;  %v2837_v54 = vld [vmem:[%s4375_s4 + $0x90] sm:$0xff] }
 0x22e   :  { %2683 = vmatmul.msk.bf16.vlgmr.msra.gmra.mxu1 %vm782_vm1, %v2819_v38 }
 0x23e   :  { %2684 = vmatmul.msk.bf16.gmra.mxu1 %vm782_vm1, %v2820_v4 }
 0x24e   :  { %2685 = vmatmul.msk.bf16.gmra.mxu1 %vm782_vm1, %v2821_v7 }
 0x25e   :  { %2686 = vmatmul.msk.bf16.gmra.mxu1 %vm782_vm1, %v2822_v9 }
 0x26e   :  { %2687 = vmatmul.msk.bf16.gmra.mxu1 %vm782_vm1, %v2823_v10 }
 0x27e   :  { %2688 = vmatmul.msk.bf16.gmra.mxu1 %vm782_vm1, %v2824_v11 }
 0x28e   :  { %2689 = vmatmul.msk.bf16.gmra.mxu1 %vm782_vm1, %v2825_v12 }
 0x29e   :  { %2690 = vmatmul.msk.bf16.gmra.mxu1 %vm782_vm1, %v2826_v13 }
 0x2ab   :  { %v3444_v14 = vpop.f32.mrf.mxu1 }
 0x2ae   :  { %2691 = vmatmul.msk.bf16.gmra.mxu1 %vm782_vm1, %v2827_v58 }
 0x2b3   :  { %v3447_v15 = vpop.f32.mrf.mxu1 }
 0x2bb   :  { %v3452_v17 = vpop.f32.mrf.mxu1 }
 0x2be   :  { %2692 = vmatmul.msk.bf16.gmra.mxu1 %vm782_vm1, %v2828_v16 }
 0x2c3   :  { %v3455_v18 = vpop.f32.mrf.mxu1 }
 0x2cb   :  { %v3460_v21 = vpop.f32.mrf.mxu1 }
 0x2ce   :  { %2693 = vmatmul.msk.bf16.gmra.mxu1 %vm782_vm1, %v2829_v20 }
 0x2d3   :  { %v3463_v22 = vpop.f32.mrf.mxu1 }
 0x2db   :  { %v3468_v24 = vpop.f32.mrf.mxu1 }
 0x2de   :  { %2694 = vmatmul.msk.bf16.gmra.mxu1 %vm782_vm1, %v2830_v23 }
 0x2e3   :  { %v3471_v25 = vpop.f32.mrf.mxu1 }
 0x2eb   :  { %v3476_v28 = vpop.f32.mrf.mxu1 }
 0x2ee   :  { %2695 = vmatmul.msk.bf16.gmra.mxu1 %vm782_vm1, %v2831_v27 }
 0x2f3   :  { %v3479_v30 = vpop.f32.mrf.mxu1 }
 0x2fb   :  { %v3484_v36 = vpop.f32.mrf.mxu1 }
 0x2fe   :  { %2696 = vmatmul.msk.bf16.gmra.mxu1 %vm782_vm1, %v2832_v31 }
 0x303   :  { %v3487_v44 = vpop.f32.mrf.mxu1 }
 0x30b   :  { %v3492_v49 = vpop.f32.mrf.mxu1 }
 0x30e   :  { %2697 = vmatmul.msk.bf16.gmra.mxu1 %vm782_vm1, %v2833_v46 }
 0x313   :  { %v3495_v51 = vpop.f32.mrf.mxu1 }
 0x31b   :  { %v3500_v57 = vpop.f32.mrf.mxu1 }
 0x31e   :  { %2698 = vmatmul.msk.bf16.gmra.mxu1 %vm782_vm1, %v2834_v56 }
 0x323   :  { %v3503_v33 = vpop.f32.mrf.mxu1 }
 0x32b   :  { %v908_v29 = vpop.f32.mrf.mxu1 }
 0x32c   :  { %v2723_v48 = vmul.f32 -1.442695, %v908_v29 }
 0x32e   :  { %2865 = vpow2.f32 %v2723_v48  ;;  %2699 = vmatmul.msk.bf16.gmra.mxu1 %vm782_vm1, %v2835_v35 }
 0x333   :  { %v910_v55 = vpop.f32.mrf.mxu1 }
 0x334   :  { %v2866_v59 = vpop.eup %2865  ;;  %v2724_v60 = vmul.f32 -1.442695, %v910_v55 }
 0x335   :  { %v1148_v19 = vadd.f32 1.0, %v2866_v59 }
 0x336   :  { %2867 = vpow2.f32 %v2724_v60 }
 0x337   :  { %2869 = vrcp.f32 %v1148_v19  ;;  %v1431_v32 = vand.u32 2147483648, %v1148_v19  ;;  %v1429_v2 = vand.u32 2147483647, %v1148_v19  ;;  %vm1425_vm3 = vweird.f32 %v1148_v19 }
 0x339   :  { %v1432_v40 = vor.u32 1.1754944e-38, %v1431_v32  ;;  %vm1430_vm5 = vcmp.eq.f32.partialorder %v1429_v2, 8.507059e+37 }
 0x33b   :  { %v913_v37 = vpop.f32.mrf.mxu1 }
 0x33c   :  { %v2868_v62 = vpop.eup %2867  ;;  %v2725_v0 = vmul.f32 -1.442695, %v913_v37 }
 0x33d   :  { %v2870_v8 = vpop.eup %2869  ;;  %v1149_v26 = vadd.f32 1.0, %v2868_v62 }
 0x33e   :  { %2871 = vpow2.f32 %v2725_v0  ;;  %2700 = vmatmul.msk.bf16.gmra.mxu1 %vm782_vm1, %v2836_v34  ;;  %v1421_v1 = vmul.f32 %v2870_v8, %v1148_v19  ;;  %vm1426_vm2 = vweird.f32 %v2870_v8  ;;  %v2838_v0 = vld [vmem:[%s4375_s4 + $0x98] sm:$0xff] }
 0x33f   :  { %2873 = vrcp.f32 %v1149_v26  ;;  %vm1427_vm4 = vmor %vm1425_vm3, %vm1426_vm2  ;;  %v1446_v39 = vand.u32 2147483648, %v1149_v26  ;;  %v1444_v47 = vand.u32 2147483647, %v1149_v26  ;;  %vm1440_vm7 = vweird.f32 %v1149_v26 }
 0x340   :  { %v1422_v63 = vsub.f32 1.0, %v1421_v1 }
 0x341   :  { %v1447_v13 = vor.u32 1.1754944e-38, %v1446_v39  ;;  %vm1445_vm9 = vcmp.eq.f32.partialorder %v1444_v47, 8.507059e+37  ;;  %v2839_v39 = vld [vmem:[%s4375_s4 + $0xa0] sm:$0xff]  ;;  %v2840_v47 = vld [vmem:[%s4375_s4 + $0xa8] sm:$0xff] }
 0x342   :  { %v1423_v61 = vmul.f32 %v2870_v8, %v1422_v63 }
 0x343   :  { %v915_v5 = vpop.f32.mrf.mxu1 }
 0x344   :  { %v2872_v6 = vpop.eup %2871  ;;  %v2726_v52 = vmul.f32 -1.442695, %v915_v5  ;;  %v1424_v50 = vadd.f32 %v2870_v8, %v1423_v61 }
 0x345   :  { %v2874_v3 = vpop.eup %2873  ;;  %v1150_v42 = vadd.f32 1.0, %v2872_v6 }
 0x346   :  { %2875 = vpow2.f32 %v2726_v52  ;;  %v1428_v41 = vsel %vm1427_vm4, %v2870_v8, %v1424_v50  ;;  %v1436_v43 = vmul.f32 %v2874_v3, %v1149_v26  ;;  %vm1441_vm6 = vweird.f32 %v2874_v3 }
 0x347   :  { %2877 = vrcp.f32 %v1150_v42  ;;  %v1433_v45 = vsel %vm1430_vm5, %v1432_v40, %v1428_v41  ;;  %vm1442_vm8 = vmor %vm1440_vm7, %vm1441_vm6  ;;  %v1461_v27 = vand.u32 2147483648, %v1150_v42  ;;  %v1459_v46 = vand.u32 2147483647, %v1150_v42 }
 0x348   :  { %1916 = vrot.lane.b32.xlu0 %v1433_v45, %s3176_s9  ;;  %v1437_v53 = vsub.f32 1.0, %v1436_v43  ;;  %vm1455_vm11 = vweird.f32 %v1150_v42 }
 0x349   :  { %v1462_v59 = vor.u32 1.1754944e-38, %v1461_v27  ;;  %vm1460_vm13 = vcmp.eq.f32.partialorder %v1459_v46, 8.507059e+37 }
 0x34a   :  { %v1438_v38 = vmul.f32 %v2874_v3, %v1437_v53 }
 0x34b   :  { %v918_v4 = vpop.f32.mrf.mxu1 }
 0x34c   :  { %v2876_v7 = vpop.eup %2875  ;;  %v2727_v9 = vmul.f32 -1.442695, %v918_v4  ;;  %v1439_v10 = vadd.f32 %v2874_v3, %v1438_v38 }
 0x34d   :  { %v2878_v11 = vpop.eup %2877  ;;  %v1151_v12 = vadd.f32 1.0, %v2876_v7 }
 0x34e   :  { %2879 = vpow2.f32 %v2727_v9  ;;  %2701 = vmatmul.msk.bf16.gmra.mxu1 %vm782_vm1, %v2837_v54  ;;  %v1443_v58 = vsel %vm1442_vm8, %v2874_v3, %v1439_v10  ;;  %v1451_v16 = vmul.f32 %v2878_v11, %v1150_v42  ;;  %vm1456_vm10 = vweird.f32 %v2878_v11  ;;  %v2841_v9 = vld [vmem:[%s4375_s4 + $0xb0] sm:$0xff] }
 0x34f   :  { %2881 = vrcp.f32 %v1151_v12  ;;  %v1448_v20 = vsel %vm1445_vm9, %v1447_v13, %v1443_v58  ;;  %vm1457_vm12 = vmor %vm1455_vm11, %vm1456_vm10  ;;  %v1476_v62 = vand.u32 2147483648, %v1151_v12  ;;  %v1474_v26 = vand.u32 2147483647, %v1151_v12 }
 0x350   :  { %1918 = vrot.lane.b32.xlu0 %v1448_v20, %s3176_s9  ;;  %v1452_v23 = vsub.f32 1.0, %v1451_v16  ;;  %vm1470_vm15 = vweird.f32 %v1151_v12 }
 0x351   :  { %v1477_v61 = vor.u32 1.1754944e-38, %v1476_v62  ;;  %vm1475_vm3 = vcmp.eq.f32.partialorder %v1474_v26, 8.507059e+37 }
 0x352   :  { %v1453_v31 = vmul.f32 %v2878_v11, %v1452_v23 }
 0x353   :  { %v3519_v56 = vpop.f32.mrf.mxu1 }
 0x354   :  { %v2880_v35 = vpop.eup %2879  ;;  %v1454_v29 = vadd.f32 %v2878_v11, %v1453_v31  ;;  %v2728_v23 = vmul.f32 -1.442695, %v3519_v56 }
 0x355   :  { %v2882_v48 = vpop.eup %2881  ;;  %v1152_v55 = vadd.f32 1.0, %v2880_v35 }
 0x356   :  { %v1458_v60 = vsel %vm1457_vm12, %v2878_v11, %v1454_v29  ;;  %v1466_v19 = vmul.f32 %v2882_v48, %v1151_v12  ;;  %vm1471_vm14 = vweird.f32 %v2882_v48  ;;  %v2842_v12 = vld [vmem:[%s4375_s4 + $0xb8] sm:$0xff]  ;;  %s3177_s4 = smov 112  }
 0x357   :  { %2883 = vrcp.f32 %v1152_v55  ;;  %v1463_v34 = vsel %vm1460_vm13, %v1462_v59, %v1458_v60  ;;  %vm1472_vm2 = vmor %vm1470_vm15, %vm1471_vm14  ;;  %v1491_v50 = vand.u32 2147483648, %v1152_v55  ;;  %v1489_v42 = vand.u32 2147483647, %v1152_v55 }
 0x358   :  { %1920 = vrot.lane.b32.xlu2 %v1463_v34, %s3176_s9  ;;  %v1467_v37 = vsub.f32 1.0, %v1466_v19  ;;  %vm1485_vm5 = vweird.f32 %v1152_v55 }
 0x359   :  { %v1492_v43 = vor.u32 1.1754944e-38, %v1491_v50  ;;  %vm1490_vm7 = vcmp.eq.f32.partialorder %v1489_v42, 8.507059e+37 }
 0x35a   :  { %v1468_v8 = vmul.f32 %v2882_v48, %v1467_v37 }
 0x35b   :  { %v923_v1 = vpop.f32.mrf.mxu1 }
 0x35c   :  { %v1469_v63 = vadd.f32 %v2882_v48, %v1468_v8  ;;  %v2729_v46 = vmul.f32 -1.442695, %v923_v1 }
 0x35d   :  { %v2884_v32 = vpop.eup %2883 }
 0x35e   :  { %2702 = vmatmul.msk.bf16.gmra.mxu1 %vm782_vm1, %v2838_v0  ;;  %v1473_v2 = vsel %vm1472_vm2, %v2882_v48, %v1469_v63  ;;  %v1481_v5 = vmul.f32 %v2884_v32, %v1152_v55  ;;  %vm1486_vm4 = vweird.f32 %v2884_v32 }
 0x35f   :  { %v1478_v6 = vsel %vm1475_vm3, %v1477_v61, %v1473_v2  ;;  %vm1487_vm6 = vmor %vm1485_vm5, %vm1486_vm4 }
 0x360   :  { %1922 = vrot.lane.b32.xlu2 %v1478_v6, %s3176_s9  ;;  %v1482_v52 = vsub.f32 1.0, %v1481_v5 }
 0x362   :  { %v1483_v3 = vmul.f32 %v2884_v32, %v1482_v52 }
 0x363   :  { %v925_v40 = vpop.f32.mrf.mxu1 }
 0x364   :  { %v1484_v41 = vadd.f32 %v2884_v32, %v1483_v3  ;;  %v2730_v60 = vmul.f32 -1.442695, %v925_v40 }
 0x366   :  { %v1488_v45 = vsel %vm1487_vm6, %v2884_v32, %v1484_v41 }
 0x367   :  { %v1493_v53 = vsel %vm1490_vm7, %v1492_v43, %v1488_v45 }
 0x368   :  { %1924 = vrot.lane.b32.xlu2 %v1493_v53, %s3176_s9 }
 0x36b   :  { %v3531_v54 = vpop.f32.mrf.mxu1 }
 0x36c   :  { %v2731_v43 = vmul.f32 -1.442695, %v3531_v54 }
 0x36e   :  { %2703 = vmatmul.msk.bf16.gmra.mxu1 %vm782_vm1, %v2839_v39 }
 0x373   :  { %v3534_v38 = vpop.f32.mrf.mxu1 }
 0x37b   :  { %v3539_v4 = vpop.f32.mrf.mxu1 }
 0x37e   :  { %2704 = vmatmul.msk.bf16.gmra.mxu1 %vm782_vm1, %v2840_v47 }
 0x383   :  { %v3542_v7 = vpop.f32.mrf.mxu1 }
 0x38b   :  { %v3547_v10 = vpop.f32.mrf.mxu1 }
 0x38e   :  { %2705 = vmatmul.msk.bf16.gmra.mxu1 %vm782_vm1, %v2841_v9 }
 0x393   :  { %v3550_v11 = vpop.f32.mrf.mxu1 }
 0x39b   :  { %v3555_v13 = vpop.f32.mrf.mxu1 }
 0x39e   :  { %2706 = vmatmul.msk.bf16.gmra.mxu1 %vm782_vm1, %v2842_v12 }
 0x3a3   :  { %v3558_v58 = vpop.f32.mrf.mxu1 }
 0x3ab   :  { %v948_v16 = vpop.f32.mrf.mxu1 }
 0x3ac   :  { %v2739_v20 = vmul.f32 -1.442695, %v948_v16 }
 0x3ae   :  { %2885 = vpow2.f32 %v2739_v20 }
 0x3af   :  { %2887 = vpow2.f32 %v2728_v23 }
 0x3b3   :  { %v950_v27 = vpop.f32.mrf.mxu1 }
 0x3b4   :  { %v2886_v31 = vpop.eup %2885  ;;  %v2740_v35 = vmul.f32 -1.442695, %v950_v27 }
 0x3b5   :  { %v1164_v29 = vadd.f32 1.0, %v2886_v31  ;;  %v2888_v48 = vpop.eup %2887  ;;  %v2732_v31 = vmul.f32 -1.442695, %v3534_v38 }
 0x3b6   :  { %2889 = vpow2.f32 %v2740_v35  ;;  %v3561_v0 = vadd.f32 1.0, %v2888_v48  ;;  %v2707_v48 = vmul.f32 -1.442695, %v3444_v14  ;;  %v3591_v14 = vld [vmem:[%s4376_s5] sm:$0xff] }
 0x3b7   :  { %2891 = vrcp.f32 %v1164_v29  ;;  %v1671_v1 = vand.u32 2147483648, %v1164_v29  ;;  %v1669_v32 = vand.u32 2147483647, %v1164_v29  ;;  %vm1665_vm9 = vweird.f32 %v1164_v29 }
 0x3b8   :  { %2893 = vpow2.f32 %v2729_v46  ;;  %vm1500_vm3 = vweird.f32 %v3561_v0 }
 0x3b9   :  { %v1672_v3 = vor.u32 1.1754944e-38, %v1671_v1  ;;  %vm1670_vm11 = vcmp.eq.f32.partialorder %v1669_v32, 8.507059e+37 }
 0x3bb   :  { %v953_v55 = vpop.f32.mrf.mxu1 }
 0x3bc   :  { %v2890_v59 = vpop.eup %2889  ;;  %v2741_v19 = vmul.f32 -1.442695, %v953_v55 }
 0x3bd   :  { %v2892_v34 = vpop.eup %2891  ;;  %v1165_v37 = vadd.f32 1.0, %v2890_v59 }
 0x3be   :  { %v2894_v62 = vpop.eup %2893  ;;  %2895 = vpow2.f32 %v2741_v19  ;;  %v1661_v56 = vmul.f32 %v2892_v34, %v1164_v29  ;;  %vm1666_vm8 = vweird.f32 %v2892_v34 }
 0x3bf   :  { %2897 = vrcp.f32 %v1165_v37  ;;  %v3563_v26 = vadd.f32 1.0, %v2894_v62  ;;  %vm1667_vm10 = vmor %vm1665_vm9, %vm1666_vm8  ;;  %v1686_v9 = vand.u32 2147483648, %v1165_v37  ;;  %v1684_v16 = vand.u32 2147483647, %v1165_v37 }
 0x3c0   :  { %2899 = vpow2.f32 %v2730_v60  ;;  %v1662_v8 = vsub.f32 1.0, %v1661_v56  ;;  %vm1680_vm13 = vweird.f32 %v1165_v37  ;;  %v2072_v56 = vunpack.c.l.b16 %v3591_v14 }
 0x3c1   :  { %2901 = vrcp.f32 %v3561_v0  ;;  %v1687_v59 = vor.u32 1.1754944e-38, %v1686_v9  ;;  %vm1685_vm15 = vcmp.eq.f32.partialorder %v1684_v16, 8.507059e+37  ;;  %vm1515_vm9 = vweird.f32 %v3563_v26 }
 0x3c2   :  { %v1663_v63 = vmul.f32 %v2892_v34, %v1662_v8  ;;  %2903 = vrcp.f32 %v3563_v26 }
 0x3c3   :  { %v955_v61 = vpop.f32.mrf.mxu1 }
 0x3c4   :  { %v2896_v2 = vpop.eup %2895  ;;  %v2742_v5 = vmul.f32 -1.442695, %v955_v61  ;;  %v1664_v6 = vadd.f32 %v2892_v34, %v1663_v63  ;;  %v1504_v63 = vand.u32 2147483647, %v3561_v0 }
 0x3c5   :  { %v2898_v52 = vpop.eup %2897  ;;  %v3567_v50 = vadd.f32 1.0, %v2896_v2  ;;  %v2076_v2 = vpack.c.b16 %v2072_v56, %v2072_v56 }
 0x3c6   :  { %v2900_v42 = vpop.eup %2899  ;;  %2905 = vpow2.f32 %v2742_v5  ;;  %v1668_v40 = vsel %vm1667_vm10, %v2892_v34, %v1664_v6  ;;  %v1676_v41 = vmul.f32 %v2898_v52, %v1165_v37  ;;  %vm1681_vm12 = vweird.f32 %v2898_v52 }
 0x3c7   :  { %2907 = vrcp.f32 %v3567_v50  ;;  %v1673_v45 = vsel %vm1670_vm11, %v1672_v3, %v1668_v40  ;;  %v3571_v53 = vpop.eup %2901  ;;  %v3574_v47 = vadd.f32 1.0, %v2900_v42  ;;  %vm1682_vm14 = vmor %vm1680_vm13, %vm1681_vm12  ;;  %v1701_v1 = vand.u32 2147483648, %v3567_v50 }
 0x3c8   :  { %1996 = vrot.lane.b32.xlu1 %v1673_v45, %s3177_s4  ;;  %v1677_v39 = vsub.f32 1.0, %v1676_v41  ;;  %v3576_v20 = vpop.eup %2903  ;;  %2909 = vpow2.f32 %v2731_v43  ;;  %v1496_v54 = vmul.f32 %v3571_v53, %v3561_v0  ;;  %v1699_v61 = vand.u32 2147483647, %v3567_v50 }
 0x3c9   :  { %2911 = vrcp.f32 %v3574_v47  ;;  %v1511_v37 = vmul.f32 %v3576_v20, %v3563_v26  ;;  %v1506_v3 = vand.u32 2147483648, %v3561_v0  ;;  %vm1695_vm4 = vweird.f32 %v3567_v50 }
 0x3ca   :  { %v1678_v12 = vmul.f32 %v2898_v52, %v1677_v39  ;;  %v1497_v34 = vsub.f32 1.0, %v1496_v54  ;;  %v2105_v45 = vsel %vm855_vm0, %v2076_v2, 0  ;;  %v1702_v16 = vor.u32 1.1754944e-38, %v1701_v1 }
 0x3cb   :  { %v958_v23 = vpop.f32.mrf.mxu1  ;;  %v1512_v42 = vsub.f32 1.0, %v1511_v37  ;;  %vm1501_vm6 = vweird.f32 %v3571_v53  ;;  %2123 = vmatpush.bf16.msrb.mxu2 %v2105_v45  ;;  %vm1700_vm7 = vcmp.eq.f32.partialorder %v1699_v61, 8.507059e+37  ;;  %vm3613_vm8 = vcmp.eq.f32.partialorder %v1504_v63, 8.507059e+37 }
 0x3cc   :  { %v2906_v27 = vpop.eup %2905  ;;  %v2743_v46 = vmul.f32 -1.442695, %v958_v23  ;;  %v1679_v35 = vadd.f32 %v2898_v52, %v1678_v12  ;;  %vm3637_vm10 = vmor %vm1500_vm3, %vm1501_vm6  ;;  %vm1516_vm12 = vweird.f32 %v3576_v20 }
 0x3cd   :  { %v2908_v29 = vpop.eup %2907  ;;  %v3583_v55 = vadd.f32 1.0, %v2906_v27 }
 0x3ce   :  { %2913 = vpow2.f32 %v2743_v46  ;;  %v1683_v60 = vsel %vm1682_vm14, %v2898_v52, %v1679_v35  ;;  %v1691_v19 = vmul.f32 %v2908_v29, %v3567_v50  ;;  %v2910_v8 = vpop.eup %2909  ;;  %vm1696_vm2 = vweird.f32 %v2908_v29 }
 0x3cf   :  { %2915 = vrcp.f32 %v3583_v55  ;;  %v1688_v38 = vsel %vm1685_vm15, %v1687_v59, %v1683_v60  ;;  %v3600_v5 = vpop.eup %2911  ;;  %v1498_v52 = vmul.f32 %v3571_v53, %v1497_v34  ;;  %v3607_v9 = vadd.f32 1.0, %v2910_v8  ;;  %vm1697_vm5 = vmor %vm1695_vm4, %vm1696_vm2 }
 0x3d0   :  { %2917 = vpow2.f32 %v2732_v31  ;;  %1998 = vrot.lane.b32.xlu1 %v1688_v38, %s3177_s4  ;;  %v1692_v62 = vsub.f32 1.0, %v1691_v19  ;;  %v2733_v59 = vmul.f32 -1.442695, %v3539_v4  ;;  %v1716_v38 = vand.u32 2147483648, %v3583_v55  ;;  %vm3661_vm2 = vmor %vm1515_vm9, %vm1516_vm12 }
 0x3d1   :  { %2919 = vpow2.f32 %v2707_v48  ;;  %v1499_v35 = vadd.f32 %v3571_v53, %v1498_v52  ;;  %v1513_v48 = vmul.f32 %v3576_v20, %v1512_v42  ;;  %v1519_v34 = vand.u32 2147483647, %v3563_v26 }
 0x3d2   :  { %v1693_v32 = vmul.f32 %v2908_v29, %v1692_v62  ;;  %v1526_v37 = vmul.f32 %v3600_v5, %v3574_v47  ;;  %v1714_v56 = vand.u32 2147483647, %v3583_v55  ;;  %vm1710_vm13 = vweird.f32 %v3583_v55 }
 0x3d3   :  { %v960_v6 = vpop.f32.mrf.mxu1  ;;  %v1503_v1 = vsel %vm3637_vm10, %v3571_v53, %v1499_v35  ;;  %v1514_v63 = vadd.f32 %v3576_v20, %v1513_v48  ;;  %v1717_v53 = vor.u32 1.1754944e-38, %v1716_v38  ;;  %vm1520_vm3 = vcmp.eq.f32.partialorder %v1519_v34, 8.507059e+37 }
 0x3d4   :  { %v2914_v40 = vpop.eup %2913  ;;  %v2744_v41 = vmul.f32 -1.442695, %v960_v6  ;;  %v1694_v43 = vadd.f32 %v2908_v29, %v1693_v32  ;;  %v1521_v32 = vand.u32 2147483648, %v3563_v26  ;;  %vm1715_vm15 = vcmp.eq.f32.partialorder %v1714_v56, 8.507059e+37 }
 0x3d5   :  { %v2916_v39 = vpop.eup %2915  ;;  %v3609_v12 = vadd.f32 1.0, %v2914_v40  ;;  %v1534_v35 = vand.u32 2147483647, %v3574_v47  ;;  %vm1530_vm9 = vweird.f32 %v3574_v47 }
 0x3d6   :  { %v2918_v23 = vpop.eup %2917  ;;  %2921 = vpow2.f32 %v2744_v41  ;;  %v1698_v54 = vsel %vm1697_vm5, %v2908_v29, %v1694_v43  ;;  %v1706_v50 = vmul.f32 %v2916_v39, %v3583_v55  ;;  %v1507_v29 = vor.u32 1.1754944e-38, %v1506_v3 }
 0x3d7   :  { %v3618_v31 = vpop.eup %2919  ;;  %2923 = vrcp.f32 %v3609_v12  ;;  %v1703_v46 = vsel %vm1700_vm7, %v1702_v16, %v1698_v54  ;;  %v3626_v19 = vadd.f32 1.0, %v2918_v23  ;;  %vm1711_vm11 = vweird.f32 %v2916_v39 }
 0x3d8   :  { %2000 = vrot.lane.b32.xlu0 %v1703_v46, %s3177_s4  ;;  %v1707_v60 = vsub.f32 1.0, %v1706_v50  ;;  %2925 = vrcp.f32 %v3607_v9  ;;  %vm1712_vm14 = vmor %vm1710_vm13, %vm1711_vm11  ;;  %v1527_v3 = vsub.f32 1.0, %v1526_v37  ;;  %v1508_v41 = vsel %vm3613_vm8, %v1507_v29, %v1503_v1 }
 0x3d9   :  { %2927 = vpow2.f32 %v2733_v59  ;;  %v2734_v16 = vmul.f32 -1.442695, %v3542_v7  ;;  %v1518_v23 = vsel %vm3661_vm2, %v3576_v20, %v1514_v63  ;;  %v1522_v54 = vor.u32 1.1754944e-38, %v1521_v32 }
 0x3da   :  { %v1708_v62 = vmul.f32 %v2916_v39, %v1707_v60  ;;  %2929 = vrcp.f32 %v3626_v19  ;;  %v1731_v27 = vand.u32 2147483648, %v3609_v12  ;;  %v1528_v50 = vmul.f32 %v3600_v5, %v1527_v3 }
 0x3db   :  { %v963_v8 = vpop.f32.mrf.mxu1  ;;  %v1729_v7 = vand.u32 2147483647, %v3609_v12  ;;  %v1523_v29 = vsel %vm1520_vm3, %v1522_v54, %v1518_v23  ;;  %vm1531_vm5 = vweird.f32 %v3600_v5  ;;  %v1536_v20 = vand.u32 2147483648, %v3574_v47 }
 0x3dc   :  { %v2922_v0 = vpop.eup %2921  ;;  %v2745_v61 = vmul.f32 -1.442695, %v963_v8  ;;  %v1709_v2 = vadd.f32 %v2916_v39, %v1708_v62  ;;  %vm1725_vm6 = vweird.f32 %v3609_v12  ;;  %v1732_v8 = vor.u32 1.1754944e-38, %v1731_v27  ;;  %vm3711_vm11 = vmor %vm1530_vm9, %vm1531_vm5 }
 0x3dd   :  { %v2924_v6 = vpop.eup %2923  ;;  %v3650_v52 = vadd.f32 1.0, %v2922_v0  ;;  %v1529_v1 = vadd.f32 %v3600_v5, %v1528_v50  ;;  %vm1730_vm8 = vcmp.eq.f32.partialorder %v1729_v7, 8.507059e+37  ;;  %vm3701_vm10 = vcmp.eq.f32.partialorder %v1534_v35, 8.507059e+37 }
 0x3de   :  { %2931 = vpow2.f32 %v2745_v61  ;;  %v1713_v42 = vsel %vm1712_vm14, %v2916_v39, %v1709_v2  ;;  %v1721_v40 = vmul.f32 %v2924_v6, %v3609_v12  ;;  %v3665_v45 = vpop.eup %2925  ;;  %v3668_v39 = vmul.f32 -1.442695, %v3447_v15 }
 0x3df   :  { %2933 = vrcp.f32 %v3650_v52  ;;  %v1718_v55 = vsel %vm1715_vm15, %v1717_v53, %v1713_v42  ;;  %v2928_v46 = vpop.eup %2927  ;;  %vm1726_vm4 = vweird.f32 %v2924_v6  ;;  %v1541_v60 = vmul.f32 %v3665_v45, %v3607_v9 }
 0x3e0   :  { %1926 = vrot.lane.b32.xlu0 %v1508_v41, %s3176_s9  ;;  %2002 = vrot.lane.b32.xlu1 %v1718_v55, %s3177_s4  ;;  %v1722_v26 = vsub.f32 1.0, %v1721_v40  ;;  %v3680_v48 = vpop.eup %2929  ;;  %2935 = vpow2.f32 %v2734_v16  ;;  %v3687_v62 = vadd.f32 1.0, %v2928_v46  ;;  %vm1727_vm7 = vmor %vm1725_vm6, %vm1726_vm4  ;;  %v2735_v2 = vmul.f32 -1.442695, %v3547_v10 }
 0x3e1   :  { %v1542_v61 = vsub.f32 1.0, %v1541_v60  ;;  %v1556_v12 = vmul.f32 %v3680_v48, %v3626_v19  ;;  %v1537_v3 = vor.u32 1.1754944e-38, %v1536_v20  ;;  %v1746_v42 = vand.u32 2147483648, %v3650_v52 }
 0x3e2   :  { %v1723_v15 = vmul.f32 %v2924_v6, %v1722_v26  ;;  %v1549_v40 = vand.u32 2147483647, %v3607_v9  ;;  %v1551_v41 = vand.u32 2147483648, %v3607_v9  ;;  %v1744_v43 = vand.u32 2147483647, %v3650_v52 }
 0x3e3   :  { %v965_v59 = vpop.f32.mrf.mxu1  ;;  %v1533_v23 = vsel %vm3711_vm11, %v3600_v5, %v1529_v1  ;;  %v1543_v26 = vmul.f32 %v3665_v45, %v1542_v61  ;;  %vm1546_vm13 = vweird.f32 %v3665_v45  ;;  %v1557_v54 = vsub.f32 1.0, %v1556_v12 }
 0x3e4   :  { %v2932_v38 = vpop.eup %2931  ;;  %v2746_v34 = vmul.f32 -1.442695, %v965_v59  ;;  %v1724_v37 = vadd.f32 %v2924_v6, %v1723_v15  ;;  %vm1740_vm14 = vweird.f32 %v3650_v52  ;;  %v2736_v35 = vmul.f32 -1.442695, %v3550_v11 }
 0x3e5   :  { %v2934_v4 = vpop.eup %2933  ;;  %v3689_v56 = vadd.f32 1.0, %v2932_v38  ;;  %v1747_v5 = vor.u32 1.1754944e-38, %v1746_v42  ;;  %vm1745_vm2 = vcmp.eq.f32.partialorder %v1744_v43, 8.507059e+37  ;;  %v1544_v38 = vadd.f32 %v3665_v45, %v1543_v26 }
 0x3e6   :  { %2937 = vpow2.f32 %v2746_v34  ;;  %v1728_v63 = vsel %vm1727_vm7, %v2924_v6, %v1724_v37  ;;  %v1736_v32 = vmul.f32 %v2934_v4, %v3650_v52  ;;  %v2936_v55 = vpop.eup %2935  ;;  %vm1741_vm12 = vweird.f32 %v2934_v4 }
 0x3e7   :  { %2939 = vrcp.f32 %v3689_v56  ;;  %v1733_v0 = vsel %vm1730_vm8, %v1732_v8, %v1728_v63  ;;  %v3722_v7 = vadd.f32 1.0, %v2936_v55  ;;  %vm1742_vm15 = vmor %vm1740_vm14, %vm1741_vm12  ;;  %v1538_v52 = vsel %vm3701_vm10, %v1537_v3, %v1533_v23 }
 0x3e8   :  { %1928 = vrot.lane.b32.xlu0 %v1523_v29, %s3176_s9  ;;  %2004 = vrot.lane.b32.xlu1 %v1733_v0, %s3177_s4  ;;  %v1737_v53 = vsub.f32 1.0, %v1736_v32  ;;  %2941 = vrcp.f32 %v3687_v62  ;;  %vm1545_vm3 = vweird.f32 %v3607_v9  ;;  %vm3738_vm4 = vcmp.eq.f32.partialorder %v1549_v40, 8.507059e+37 }
 0x3e9   :  { %2943 = vpow2.f32 %v2735_v2  ;;  %v1552_v37 = vor.u32 1.1754944e-38, %v1551_v41  ;;  %v1761_v8 = vand.u32 2147483648, %v3689_v56  ;;  %v1558_v1 = vmul.f32 %v3680_v48, %v1557_v54  ;;  %vm3748_vm6 = vmor %vm1545_vm3, %vm1546_vm13 }
 0x3ea   :  { %v1738_v47 = vmul.f32 %v2934_v4, %v1737_v53  ;;  %vm1560_vm5 = vweird.f32 %v3626_v19  ;;  %v1759_v0 = vand.u32 2147483647, %v3689_v56  ;;  %v1548_v12 = vsel %vm3748_vm6, %v3665_v45, %v1544_v38 }
 0x3eb   :  { %v968_v16 = vpop.f32.mrf.mxu1  ;;  %v1564_v2 = vand.u32 2147483647, %v3626_v19  ;;  %v1566_v6 = vand.u32 2147483648, %v3626_v19  ;;  %vm1755_vm8 = vweird.f32 %v3689_v56  ;;  %vm1561_vm9 = vweird.f32 %v3680_v48 }
 0x3ec   :  { %v2938_v27 = vpop.eup %2937  ;;  %v2747_v50 = vmul.f32 -1.442695, %v968_v16  ;;  %v1739_v46 = vadd.f32 %v2934_v4, %v1738_v47  ;;  %v1762_v45 = vor.u32 1.1754944e-38, %v1761_v8  ;;  %v1559_v47 = vadd.f32 %v3680_v48, %v1558_v1  ;;  %vm3782_vm12 = vmor %vm1560_vm5, %vm1561_vm9 }
 0x3ed   :  { %v2940_v15 = vpop.eup %2939  ;;  %v3725_v59 = vadd.f32 1.0, %v2938_v27  ;;  %vm1760_vm11 = vcmp.eq.f32.partialorder %v1759_v0, 8.507059e+37  ;;  %vm3786_vm13 = vcmp.eq.f32.partialorder %v1564_v2, 8.507059e+37  ;;  %v1581_v11 = vand.u32 2147483648, %v3687_v62 }
 0x3ee   :  { %2945 = vpow2.f32 %v2747_v50  ;;  %v1743_v29 = vsel %vm1742_vm15, %v2934_v4, %v1739_v46  ;;  %v1751_v20 = vmul.f32 %v2940_v15, %v3689_v56  ;;  %v3733_v34 = vpop.eup %2941  ;;  %vm1756_vm7 = vweird.f32 %v2940_v15 }
 0x3ef   :  { %2947 = vrcp.f32 %v3725_v59  ;;  %v1748_v60 = vsel %vm1745_vm2, %v1747_v5, %v1743_v29  ;;  %v2944_v63 = vpop.eup %2943  ;;  %v1571_v53 = vmul.f32 %v3733_v34, %v3687_v62  ;;  %vm1757_vm10 = vmor %vm1755_vm8, %vm1756_vm7  ;;  %v1553_v56 = vsel %vm3738_vm4, %v1552_v37, %v1548_v12 }
 0x3f0   :  { %1930 = vrot.lane.b32.xlu1 %v1538_v52, %s3176_s9  ;;  %2006 = vrot.lane.b32.xlu2 %v1748_v60, %s3177_s4  ;;  %v1752_v4 = vsub.f32 1.0, %v1751_v20  ;;  %2949 = vrcp.f32 %v3722_v7  ;;  %v3762_v55 = vadd.f32 1.0, %v2944_v63  ;;  %v2737_v50 = vmul.f32 -1.442695, %v3555_v13 }
 0x3f1   :  { %2951 = vpow2.f32 %v2736_v35  ;;  %v1572_v54 = vsub.f32 1.0, %v1571_v53  ;;  %v1563_v13 = vsel %vm3782_vm12, %v3680_v48, %v1559_v47  ;;  %v1776_v5 = vand.u32 2147483648, %v3725_v59 }
 0x3f2   :  { %v1753_v32 = vmul.f32 %v2940_v15, %v1752_v4  ;;  %v1579_v29 = vand.u32 2147483647, %v3687_v62  ;;  %v1774_v20 = vand.u32 2147483647, %v3725_v59  ;;  %vm1770_vm15 = vweird.f32 %v3725_v59 }
 0x3f3   :  { %v970_v61 = vpop.f32.mrf.mxu1  ;;  %v1573_v38 = vmul.f32 %v3733_v34, %v1572_v54  ;;  %vm1576_vm3 = vweird.f32 %v3733_v34  ;;  %vm1575_vm5 = vweird.f32 %v3687_v62  ;;  %v1594_v62 = vand.u32 2147483647, %v3722_v7 }
 0x3f4   :  { %v2946_v3 = vpop.eup %2945  ;;  %v2748_v42 = vmul.f32 -1.442695, %v970_v61  ;;  %v1754_v40 = vadd.f32 %v2940_v15, %v1753_v32  ;;  %v1777_v32 = vor.u32 1.1754944e-38, %v1776_v5  ;;  %vm1775_vm4 = vcmp.eq.f32.partialorder %v1774_v20, 8.507059e+37  ;;  %vm3832_vm7 = vmor %vm1575_vm5, %vm1576_vm3 }
 0x3f5   :  { %v2948_v41 = vpop.eup %2947  ;;  %v3764_v10 = vadd.f32 1.0, %v2946_v3  ;;  %v1574_v2 = vadd.f32 %v3733_v34, %v1573_v38  ;;  %v3818_v3 = vadd.f32 1.0, %v3618_v31  ;;  %vm3825_vm6 = vcmp.eq.f32.partialorder %v1579_v29, 8.507059e+37 }
 0x3f6   :  { %2953 = vpow2.f32 %v2748_v42  ;;  %v1758_v43 = vsel %vm1757_vm10, %v2940_v15, %v1754_v40  ;;  %v1766_v16 = vmul.f32 %v2948_v41, %v3725_v59  ;;  %v3769_v23 = vpop.eup %2949  ;;  %vm1771_vm14 = vweird.f32 %v2948_v41 }
 0x3f7   :  { %2955 = vrcp.f32 %v3764_v10  ;;  %v1763_v26 = vsel %vm1760_vm11, %v1762_v45, %v1758_v43  ;;  %v2952_v27 = vpop.eup %2951  ;;  %v1586_v48 = vmul.f32 %v3769_v23, %v3722_v7  ;;  %vm1772_vm2 = vmor %vm1770_vm15, %vm1771_vm14  ;;  %v2738_v42 = vmul.f32 -1.442695, %v3558_v58 }
 0x3f8   :  { %2957 = vpow2.f32 %v3668_v39  ;;  %1932 = vrot.lane.b32.xlu1 %v1553_v56, %s3176_s9  ;;  %2008 = vrot.lane.b32.xlu2 %v1763_v26, %s3177_s4  ;;  %v1767_v35 = vsub.f32 1.0, %v1766_v16  ;;  %v1567_v39 = vor.u32 1.1754944e-38, %v1566_v6  ;;  %v3797_v52 = vadd.f32 1.0, %v2952_v27 }
 0x3f9   :  { %2959 = vrcp.f32 %v3762_v55  ;;  %v1587_v6 = vsub.f32 1.0, %v1586_v48  ;;  %v1582_v45 = vor.u32 1.1754944e-38, %v1581_v11  ;;  %v1791_v47 = vand.u32 2147483648, %v3764_v10 }
 0x3fa   :  { %v1768_v19 = vmul.f32 %v2948_v41, %v1767_v35  ;;  %2961 = vpow2.f32 %v2737_v50  ;;  %v1568_v9 = vsel %vm3786_vm13, %v1567_v39, %v1563_v13  ;;  %v1789_v16 = vand.u32 2147483647, %v3764_v10 }
 0x3fb   :  { %v973_v60 = vpop.f32.mrf.mxu1  ;;  %v1578_v26 = vsel %vm3832_vm7, %v3733_v34, %v1574_v2  ;;  %v1588_v54 = vmul.f32 %v3769_v23, %v1587_v6  ;;  %v1596_v27 = vand.u32 2147483648, %v3722_v7  ;;  %vm1785_vm9 = vweird.f32 %v3764_v10 }
 0x3fc   :  { %v2954_v37 = vpop.eup %2953  ;;  %v2749_v4 = vmul.f32 -1.442695, %v973_v60  ;;  %v1769_v8 = vadd.f32 %v2948_v41, %v1768_v19  ;;  %v1792_v34 = vor.u32 1.1754944e-38, %v1791_v47  ;;  %vm1591_vm11 = vweird.f32 %v3769_v23 }
 0x3fd   :  { %v2956_v1 = vpop.eup %2955  ;;  %v3804_v63 = vadd.f32 1.0, %v2954_v37  ;;  %vm1790_vm12 = vcmp.eq.f32.partialorder %v1789_v16, 8.507059e+37  ;;  %v1589_v38 = vadd.f32 %v3769_v23, %v1588_v54  ;;  %v3863_v37 = vmul.f32 -1.442695, %v3452_v17 }
 0x3fe   :  { %v3810_v0 = vpop.eup %2957  ;;  %2963 = vpow2.f32 %v2749_v4  ;;  %v1773_v61 = vsel %vm1772_vm2, %v2948_v41, %v1769_v8  ;;  %v1781_v12 = vmul.f32 %v2956_v1, %v3764_v10  ;;  %vm1786_vm8 = vweird.f32 %v2956_v1 }
 0x3ff   :  { %2965 = vrcp.f32 %v3804_v63  ;;  %v1778_v59 = vsel %vm1775_vm4, %v1777_v32, %v1773_v61  ;;  %v3815_v53 = vpop.eup %2959  ;;  %vm1787_vm10 = vmor %vm1785_vm9, %vm1786_vm8  ;;  %v1583_v10 = vsel %vm3825_vm6, %v1582_v45, %v1578_v26  ;;  %vm1590_vm13 = vweird.f32 %v3722_v7 }
 0x400   :  { %2967 = vrcp.f32 %v3797_v52  ;;  %1934 = vrot.lane.b32.xlu2 %v1568_v9, %s3176_s9  ;;  %2010 = vrot.lane.b32.xlu0 %v1778_v59, %s3177_s4  ;;  %v1782_v40 = vsub.f32 1.0, %v1781_v12  ;;  %v2962_v31 = vpop.eup %2961  ;;  %v1601_v50 = vmul.f32 %v3815_v53, %v3762_v55  ;;  %v1806_v4 = vand.u32 2147483648, %v3804_v63  ;;  %vm3872_vm14 = vmor %vm1590_vm13, %vm1591_vm11 }
 0x401   :  { %2969 = vpow2.f32 %v2738_v42  ;;  %v3846_v39 = vadd.f32 1.0, %v2962_v31  ;;  %v1804_v17 = vand.u32 2147483647, %v3804_v63  ;;  %v1593_v7 = vsel %vm3872_vm14, %v3769_v23, %v1589_v38 }
 0x402   :  { %v1783_v58 = vmul.f32 %v2956_v1, %v1782_v40  ;;  %v1602_v48 = vsub.f32 1.0, %v1601_v50  ;;  %vm3880_vm2 = vcmp.eq.f32.partialorder %v1594_v62, 8.507059e+37  ;;  %v1597_v59 = vor.u32 1.1754944e-38, %v1596_v27 }
 0x403   :  { %v975_v56 = vpop.f32.mrf.mxu1  ;;  %v1609_v2 = vand.u32 2147483647, %v3762_v55  ;;  %vm1800_vm3 = vweird.f32 %v3804_v63  ;;  %v1807_v23 = vor.u32 1.1754944e-38, %v1806_v4  ;;  %vm1805_vm5 = vcmp.eq.f32.partialorder %v1804_v17, 8.507059e+37 }
 0x404   :  { %v2964_v46 = vpop.eup %2963  ;;  %v2750_v15 = vmul.f32 -1.442695, %v975_v56  ;;  %v1784_v35 = vadd.f32 %v2956_v1, %v1783_v58  ;;  %v1603_v41 = vmul.f32 %v3815_v53, %v1602_v48  ;;  %v1611_v26 = vand.u32 2147483648, %v3762_v55 }
 0x405   :  { %v2966_v13 = vpop.eup %2965  ;;  %v3848_v5 = vadd.f32 1.0, %v2964_v46  ;;  %v3902_v27 = vadd.f32 1.0, %v3810_v0  ;;  %vm1606_vm6 = vweird.f32 %v3815_v53  ;;  %vm1605_vm7 = vweird.f32 %v3762_v55 }
 0x406   :  { %v3852_v29 = vpop.eup %2967  ;;  %2971 = vpow2.f32 %v2750_v15  ;;  %v1788_v19 = vsel %vm1787_vm10, %v2956_v1, %v1784_v35  ;;  %v1796_v20 = vmul.f32 %v2966_v13, %v3804_v63  ;;  %vm1801_vm15 = vweird.f32 %v2966_v13  ;;  %vm3917_vm10 = vmor %vm1605_vm7, %vm1606_vm6 }
 0x407   :  { %2973 = vrcp.f32 %v3848_v5  ;;  %v1793_v60 = vsel %vm1790_vm12, %v1792_v34, %v1788_v19  ;;  %v1616_v8 = vmul.f32 %v3852_v29, %v3797_v52  ;;  %v2970_v1 = vpop.eup %2969  ;;  %vm1802_vm4 = vmor %vm1800_vm3, %vm1801_vm15  ;;  %v1598_v63 = vsel %vm3880_vm2, %v1597_v59, %v1593_v7 }
 0x408   :  { %2975 = vrcp.f32 %v3818_v3  ;;  %1936 = vrot.lane.b32.xlu2 %v1583_v10, %s3176_s9  ;;  %2012 = vrot.lane.b32.xlu0 %v1793_v60, %s3177_s4  ;;  %v1797_v11 = vsub.f32 1.0, %v1796_v20  ;;  %v3887_v47 = vadd.f32 1.0, %v2970_v1  ;;  %v1604_v50 = vadd.f32 %v3815_v53, %v1603_v41 }
 0x409   :  { %2977 = vrcp.f32 %v3846_v39  ;;  %v1617_v43 = vsub.f32 1.0, %v1616_v8  ;;  %vm3909_vm8 = vcmp.eq.f32.partialorder %v1609_v2, 8.507059e+37  ;;  %v1821_v35 = vand.u32 2147483648, %v3848_v5 }
 0x40a   :  { %v1798_v32 = vmul.f32 %v2966_v13, %v1797_v11  ;;  %v1819_v34 = vand.u32 2147483647, %v3848_v5  ;;  %v1612_v55 = vor.u32 1.1754944e-38, %v1611_v26  ;;  %v1624_v10 = vand.u32 2147483647, %v3797_v52 }
 0x40b   :  { %v978_v61 = vpop.f32.mrf.mxu1  ;;  %v1618_v0 = vmul.f32 %v3852_v29, %v1617_v43  ;;  %v1626_v60 = vand.u32 2147483648, %v3797_v52  ;;  %v1608_v4 = vsel %vm3917_vm10, %v3815_v53, %v1604_v50  ;;  %vm1815_vm11 = vweird.f32 %v3848_v5 }
 0x40c   :  { %v2972_v6 = vpop.eup %2971  ;;  %v2751_v42 = vmul.f32 -1.442695, %v978_v61  ;;  %v1799_v40 = vadd.f32 %v2966_v13, %v1798_v32  ;;  %v1822_v32 = vor.u32 1.1754944e-38, %v1821_v35  ;;  %vm1621_vm13 = vweird.f32 %v3852_v29 }
 0x40d   :  { %v2974_v45 = vpop.eup %2973  ;;  %v3889_v31 = vadd.f32 1.0, %v2972_v6  ;;  %v1619_v17 = vadd.f32 %v3852_v29, %v1618_v0  ;;  %vm1820_vm14 = vcmp.eq.f32.partialorder %v1819_v34, 8.507059e+37  ;;  %v1613_v53 = vsel %vm3909_vm8, %v1612_v55, %v1608_v4 }
 0x40e   :  { %v3892_v58 = vpop.eup %2975  ;;  %2979 = vpow2.f32 %v2751_v42  ;;  %v1803_v16 = vsel %vm1802_vm4, %v2966_v13, %v1799_v40  ;;  %v1811_v62 = vmul.f32 %v2974_v45, %v3848_v5  ;;  %vm1816_vm9 = vweird.f32 %v2974_v45 }
 0x40f   :  { %2981 = vrcp.f32 %v3889_v31  ;;  %v1808_v56 = vsel %vm1805_vm5, %v1807_v23, %v1803_v16  ;;  %v3899_v54 = vpop.eup %2977  ;;  %vm1817_vm12 = vmor %vm1815_vm11, %vm1816_vm9  ;;  %vm1620_vm15 = vweird.f32 %v3797_v52  ;;  %v2710_v6 = vmul.f32 -1.442695, %v3455_v18 }
 0x410   :  { %1938 = vrot.lane.b32.xlu0 %v1598_v63, %s3176_s9  ;;  %2014 = vrot.lane.b32.xlu1 %v1808_v56, %s3177_s4  ;;  %v1812_v46 = vsub.f32 1.0, %v1811_v62  ;;  %2983 = vrcp.f32 %v3887_v47  ;;  %v1631_v38 = vmul.f32 %v3899_v54, %v3846_v39  ;;  %vm3948_vm2 = vmor %vm1620_vm15, %vm1621_vm13  ;;  %v1836_v40 = vand.u32 2147483648, %v3889_v31 }
 0x411   :  { %v1834_v52 = vand.u32 2147483647, %v3889_v31  ;;  %vm1625_vm4 = vcmp.eq.f32.partialorder %v1624_v10, 8.507059e+37  ;;  %v1627_v23 = vor.u32 1.1754944e-38, %v1626_v60  ;;  %vm1830_vm5 = vweird.f32 %v3889_v31 }
 0x412   :  { %v1813_v13 = vmul.f32 %v2974_v45, %v1812_v46  ;;  %v1632_v12 = vsub.f32 1.0, %v1631_v38  ;;  %vm1636_vm6 = vweird.f32 %v3899_v54  ;;  %v2073_v56 = vunpack.c.h.b16 %v3591_v14 }
 0x413   :  { %v980_v19 = vpop.f32.mrf.mxu1  ;;  %v1837_v46 = vor.u32 1.1754944e-38, %v1836_v40  ;;  %vm1835_vm8 = vcmp.eq.f32.partialorder %v1834_v52, 8.507059e+37  ;;  %vm1635_vm9 = vweird.f32 %v3846_v39  ;;  %v1639_v10 = vand.u32 2147483647, %v3846_v39 }
 0x414   :  { %v2980_v11 = vpop.eup %2979  ;;  %v2752_v48 = vmul.f32 -1.442695, %v980_v19  ;;  %v1814_v8 = vadd.f32 %v2974_v45, %v1813_v13  ;;  %v1633_v18 = vmul.f32 %v3899_v54, %v1632_v12  ;;  %v2069_v19 = vld [vmem:[%s4376_s5 + $0x8] sm:$0xff]  ;;  %v1641_v60 = vand.u32 2147483648, %v3846_v39  ;;  %vm3985_vm10 = vmor %vm1635_vm9, %vm1636_vm6  ;;  %s3178_s5 = smov [#allocation5]  }
 0x415   :  { %v2982_v1 = vpop.eup %2981  ;;  %v3929_v9 = vadd.f32 1.0, %v2980_v11  ;;  %v2074_v55 = vunpack.c.l.b16 %v2069_v19  ;;  %vm1640_vm13 = vcmp.eq.f32.partialorder %v1639_v10, 8.507059e+37  ;;  %s2444_s25 = sshll.u32 %s3178_s5, 4  ;;  %s2445_s25 = int_to_ptr.vmem [resolvable:$true] %s2444_s25 }
 0x416   :  { %2985 = vpow2.f32 %v2752_v48  ;;  %v1818_v61 = vsel %vm1817_vm12, %v2974_v45, %v1814_v8  ;;  %v1826_v7 = vmul.f32 %v2982_v1, %v3889_v31  ;;  %v3938_v59 = vpop.eup %2983  ;;  %vm1831_vm3 = vweird.f32 %v2982_v1 }
 0x417   :  { %2987 = vrcp.f32 %v3929_v9  ;;  %v1823_v5 = vsel %vm1820_vm14, %v1822_v32, %v1818_v61  ;;  %v1646_v43 = vmul.f32 %v3938_v59, %v3887_v47  ;;  %vm1832_vm7 = vmor %vm1830_vm5, %vm1831_vm3  ;;  %v1634_v14 = vadd.f32 %v3899_v54, %v1633_v18 }
 0x418   :  { %2989 = vpow2.f32 %v3863_v37  ;;  %1940 = vrot.lane.b32.xlu0 %v1613_v53, %s3176_s9  ;;  %2016 = vrot.lane.b32.xlu1 %v1823_v5, %s3177_s4  ;;  %v1827_v2 = vsub.f32 1.0, %v1826_v7  ;;  %v1623_v37 = vsel %vm3948_vm2, %v3852_v29, %v1619_v17  ;;  %v1849_v38 = vand.u32 2147483647, %v3929_v9 }
 0x419   :  { %2991 = vrcp.f32 %v3902_v27  ;;  %v1628_v50 = vsel %vm1625_vm4, %v1627_v23, %v1623_v37  ;;  %v1647_v34 = vsub.f32 1.0, %v1646_v43  ;;  %v1851_v11 = vand.u32 2147483648, %v3929_v9 }
 0x41a   :  { %v1828_v41 = vmul.f32 %v2982_v1, %v1827_v2  ;;  %v2077_v8 = vpack.c.b16 %v2073_v56, %v2073_v56  ;;  %v2711_v32 = vmul.f32 -1.442695, %v3460_v21  ;;  %v1638_v39 = vsel %vm3985_vm10, %v3899_v54, %v1634_v14 }
 0x41b   :  { %v983_v45 = vpop.f32.mrf.mxu1  ;;  %vm1845_vm12 = vweird.f32 %v3929_v9  ;;  %v1648_v61 = vmul.f32 %v3938_v59, %v1647_v34  ;;  %v1642_v21 = vor.u32 1.1754944e-38, %v1641_v60  ;;  %v1852_v40 = vor.u32 1.1754944e-38, %v1851_v11 }
 0x41c   :  { %v2986_v16 = vpop.eup %2985  ;;  %v2753_v62 = vmul.f32 -1.442695, %v983_v45  ;;  %v1829_v63 = vadd.f32 %v2982_v1, %v1828_v41  ;;  %v2108_v12 = vsel %vm855_vm0, %v2077_v8, 0  ;;  %vm1850_vm15 = vcmp.eq.f32.partialorder %v1849_v38, 8.507059e+37 }
 0x41d   :  { %v2988_v29 = vpop.eup %2987  ;;  %v3963_v26 = vadd.f32 1.0, %v2986_v16  ;;  %2172 = vmatpush.bf16.msra.mxu3 %v2108_v12  ;;  %v2712_v41 = vmul.f32 -1.442695, %v3463_v22  ;;  %v1643_v52 = vsel %vm1640_vm13, %v1642_v21, %v1638_v39  ;;  %v1649_v23 = vadd.f32 %v3938_v59, %v1648_v61 }
 0x41e   :  { %v3966_v15 = vpop.eup %2989  ;;  %2993 = vpow2.f32 %v2753_v62  ;;  %v1833_v35 = vsel %vm1832_vm7, %v2982_v1, %v1829_v63  ;;  %v1841_v0 = vmul.f32 %v2988_v29, %v3929_v9  ;;  %vm1846_vm11 = vweird.f32 %v2988_v29 }
 0x41f   :  { %v3969_v13 = vpop.eup %2991  ;;  %2995 = vrcp.f32 %v3963_v26  ;;  %v1838_v31 = vsel %vm1835_vm8, %v1837_v46, %v1833_v35  ;;  %v2078_v1 = vpack.c.b16 %v2074_v55, %v2074_v55  ;;  %vm1847_vm14 = vmor %vm1845_vm12, %vm1846_vm11  ;;  %vm1651_vm2 = vweird.f32 %v3938_v59 }
 0x420   :  { %2997 = vpow2.f32 %v2710_v6  ;;  %1942 = vrot.lane.b32.xlu1 %v1628_v50, %s3176_s9  ;;  %2018 = vrot.lane.b32.xlu2 %v1838_v31, %s3177_s4  ;;  %v1842_v20 = vsub.f32 1.0, %v1841_v0  ;;  %v2075_v43 = vunpack.c.h.b16 %v2069_v19  ;;  %vm1650_vm3 = vweird.f32 %v3887_v47 }
 0x421   :  { %v2111_v2 = vsel %vm855_vm0, %v2078_v1, 0  ;;  %v1654_v16 = vand.u32 2147483647, %v3887_v47  ;;  %v1656_v22 = vand.u32 2147483648, %v3887_v47  ;;  %v1866_v62 = vand.u32 2147483648, %v3963_v26  ;;  %vm4021_vm5 = vmor %vm1650_vm3, %vm1651_vm2 }
 0x422   :  { %v1843_v4 = vmul.f32 %v2988_v29, %v1842_v20  ;;  %2221 = vmatpush.bf16.msra.mxu0 %v2111_v2  ;;  %v2079_v56 = vpack.c.b16 %v2075_v43, %v2075_v43  ;;  %v4013_v50 = vadd.f32 1.0, %v3966_v15  ;;  %v1181_v46 = vmul.f32 %v3892_v58, %v3818_v3 }
 0x423   :  { %v985_v17 = vpop.f32.mrf.mxu1  ;;  %v1196_v35 = vmul.f32 %v3969_v13, %v3902_v27  ;;  %v1653_v31 = vsel %vm4021_vm5, %v3938_v59, %v1649_v23  ;;  %vm1860_vm6 = vweird.f32 %v3963_v26  ;;  %v1657_v20 = vor.u32 1.1754944e-38, %v1656_v22 }
 0x424   :  { %v2994_v7 = vpop.eup %2993  ;;  %v2754_v53 = vmul.f32 -1.442695, %v985_v17  ;;  %v1844_v5 = vadd.f32 %v2988_v29, %v1843_v4  ;;  %v2114_v14 = vsel %vm855_vm0, %v2079_v56, 0  ;;  %v1867_v55 = vor.u32 1.1754944e-38, %v1866_v62 }
 0x425   :  { %v2996_v6 = vpop.eup %2995  ;;  %v3997_v42 = vadd.f32 1.0, %v2994_v7  ;;  %2270 = vmatpush.bf16.msra.mxu2 %v2114_v14  ;;  %vm1655_vm8 = vcmp.eq.f32.partialorder %v1654_v16, 8.507059e+37  ;;  %v1182_v11 = vsub.f32 1.0, %v1181_v46  ;;  %v1197_v8 = vsub.f32 1.0, %v1196_v35  ;;  %v1917_v7 = vpop.permute.xlu0 %1916 }
 0x426   :  { %v2998_v54 = vpop.eup %2997  ;;  %2999 = vpow2.f32 %v2754_v53  ;;  %v1848_v9 = vsel %vm1847_vm14, %v2988_v29, %v1844_v5  ;;  %v1856_v37 = vmul.f32 %v2996_v6, %v3963_v26  ;;  %vm1861_vm4 = vweird.f32 %v2996_v6 }
 0x427   :  { %3001 = vrcp.f32 %v3997_v42  ;;  %v1853_v45 = vsel %vm1850_vm15, %v1852_v40, %v1848_v9  ;;  %v1864_v29 = vand.u32 2147483647, %v3963_v26  ;;  %vm1862_vm7 = vmor %vm1860_vm6, %vm1861_vm4  ;;  %v1658_v59 = vsel %vm1655_vm8, %v1657_v20, %v1653_v31 }
 0x428   :  { %1944 = vrot.lane.b32.xlu1 %v1643_v52, %s3176_s9  ;;  %2020 = vrot.lane.b32.xlu2 %v1853_v45, %s3177_s4  ;;  %v1857_v18 = vsub.f32 1.0, %v1856_v37  ;;  %3003 = vpow2.f32 %v2711_v32  ;;  %v4036_v38 = vadd.f32 1.0, %v2998_v54  ;;  %v1881_v1 = vand.u32 2147483648, %v3997_v42 }
 0x429   :  { %3005 = vpow2.f32 %v2712_v41  ;;  %vm1865_vm9 = vcmp.eq.f32.partialorder %v1864_v29, 8.507059e+37  ;;  %v1879_v17 = vand.u32 2147483647, %v3997_v42  ;;  %v1183_v61 = vmul.f32 %v3892_v58, %v1182_v11 }
 0x42a   :  { %v1858_v63 = vmul.f32 %v2996_v6, %v1857_v18  ;;  %vm1875_vm10 = vweird.f32 %v3997_v42  ;;  %v1198_v12 = vmul.f32 %v3969_v13, %v1197_v8  ;;  %v1882_v2 = vor.u32 1.1754944e-38, %v1881_v1 }
 0x42b   :  { %vm1880_vm12 = vcmp.eq.f32.partialorder %v1879_v17, 8.507059e+37  ;;  %vm1185_vm13 = vweird.f32 %v3818_v3  ;;  %vm1186_vm14 = vweird.f32 %v3892_v58  ;;  %v1191_v9 = vand.u32 2147483648, %v3818_v3 }
 0x42c   :  { %v3000_v0 = vpop.eup %2999  ;;  %v1859_v15 = vadd.f32 %v2996_v6, %v1858_v63  ;;  %v1184_v41 = vadd.f32 %v3892_v58, %v1183_v61  ;;  %v1206_v52 = vand.u32 2147483648, %v3902_v27  ;;  %v1199_v18 = vadd.f32 %v3969_v13, %v1198_v12  ;;  %vm4072_vm3 = vmor %vm1185_vm13, %vm1186_vm14 }
 0x42d   :  { %v3002_v34 = vpop.eup %3001  ;;  %v4030_v19 = vadd.f32 1.0, %v3000_v0  ;;  %vm1201_vm15 = vweird.f32 %v3969_v13  ;;  %v1189_v56 = vand.u32 2147483647, %v3818_v3  ;;  %vm1200_vm4 = vweird.f32 %v3902_v27 }
 0x42e   :  { %v1863_v10 = vsel %vm1862_vm7, %v2996_v6, %v1859_v15  ;;  %v1871_v60 = vmul.f32 %v3002_v34, %v3997_v42  ;;  %v3004_v4 = vpop.eup %3003  ;;  %vm1876_vm0 = vweird.f32 %v3002_v34  ;;  %v1204_v46 = vand.u32 2147483647, %v3902_v27  ;;  %vm4080_vm5 = vmor %vm1200_vm4, %vm1201_vm15 }
 0x42f   :  { %3007 = vrcp.f32 %v4030_v19  ;;  %v1868_v26 = vsel %vm1865_vm9, %v1867_v55, %v1863_v10  ;;  %v3006_v39 = vpop.eup %3005  ;;  %vm1877_vm11 = vmor %vm1875_vm10, %vm1876_vm0  ;;  %v4054_v37 = vadd.f32 1.0, %v3004_v4  ;;  %v1896_v43 = vand.u32 2147483648, %v4030_v19  ;;  %v1919_v55 = vpop.permute.xlu0 %1918 }
 0x430   :  { %3009 = vrcp.f32 %v4013_v50  ;;  %1946 = vrot.lane.b32.xlu2 %v1658_v59, %s3176_s9  ;;  %2022 = vrot.lane.b32.xlu0 %v1868_v26, %s3177_s4  ;;  %v1872_v48 = vsub.f32 1.0, %v1871_v60  ;;  %v4048_v21 = vadd.f32 1.0, %v3006_v39  ;;  %v1894_v63 = vand.u32 2147483647, %v4030_v19 }
 0x431   :  { %3011 = vrcp.f32 %v4036_v38  ;;  %v1192_v35 = vor.u32 1.1754944e-38, %v1191_v9  ;;  %vm1890_vm6 = vweird.f32 %v4030_v19  ;;  %v1188_v31 = vsel %vm4072_vm3, %v3892_v58, %v1184_v41 }
 0x432   :  { %v1873_v32 = vmul.f32 %v3002_v34, %v1872_v48  ;;  %3013 = vrcp.f32 %v4048_v21  ;;  %v1203_v27 = vsel %vm4080_vm5, %v3969_v13, %v1199_v18  ;;  %v1897_v15 = vor.u32 1.1754944e-38, %v1896_v43 }
 0x433   :  { %3015 = vrcp.f32 %v4054_v37  ;;  %v1207_v20 = vor.u32 1.1754944e-38, %v1206_v52  ;;  %vm1895_vm8 = vcmp.eq.f32.partialorder %v1894_v63, 8.507059e+37  ;;  %vm1190_vm9 = vcmp.eq.f32.partialorder %v1189_v56, 8.507059e+37 }
 0x434   :  { %v1874_v53 = vadd.f32 %v3002_v34, %v1873_v32  ;;  %vm1205_vm0 = vcmp.eq.f32.partialorder %v1204_v46, 8.507059e+37  ;;  %v1193_v60 = vsel %vm1190_vm9, %v1192_v35, %v1188_v31  ;;  %v2713_v13 = vmul.f32 -1.442695, %v3468_v24 }
 0x435   :  { %v3008_v5 = vpop.eup %3007  ;;  %v1208_v59 = vsel %vm1205_vm0, %v1207_v20, %v1203_v27  ;;  %v1964_v26 = vmul.f32 %v1917_v7, %v1193_v60  ;;  %v2714_v32 = vmul.f32 -1.442695, %v3471_v25  ;;  %v1221_v12 = vand.u32 2147483648, %v4013_v50 }
 0x436   :  { %v4046_v6 = vpop.eup %3009  ;;  %v1878_v40 = vsel %vm1877_vm11, %v3002_v34, %v1874_v53  ;;  %v1886_v54 = vmul.f32 %v3008_v5, %v4030_v19  ;;  %vm1891_vm2 = vweird.f32 %v3008_v5  ;;  %v4093_v34 = vpop.permute.xlu2 %1920  ;;  %v1965_v48 = vmul.f32 %v1919_v55, %v1208_v59 }
 0x437   :  { %v1883_v42 = vsel %vm1880_vm12, %v1882_v2, %v1878_v40  ;;  %v1211_v23 = vmul.f32 %v4046_v6, %v4013_v50  ;;  %v4064_v16 = vpop.eup %3011  ;;  %vm1892_vm7 = vmor %vm1890_vm6, %vm1891_vm2  ;;  %3017 = vpow2.f32 %v2713_v13  ;;  %vm1216_vm10 = vweird.f32 %v4046_v6 }
 0x438   :  { %2024 = vrot.lane.b32.xlu0 %v1883_v42, %s3177_s4  ;;  %v1887_v45 = vsub.f32 1.0, %v1886_v54  ;;  %v1226_v3 = vmul.f32 %v4064_v16, %v4036_v38  ;;  %v4095_v58 = vpop.eup %3013  ;;  %3019 = vpow2.f32 %v2714_v32  ;;  %vm1215_vm11 = vweird.f32 %v4013_v50 }
 0x439   :  { %v1212_v14 = vsub.f32 1.0, %v1211_v23  ;;  %v4099_v4 = vpop.eup %3015  ;;  %v1256_v61 = vmul.f32 %v4095_v58, %v4048_v21  ;;  %v1219_v40 = vand.u32 2147483647, %v4013_v50  ;;  %vm1231_vm12 = vweird.f32 %v4064_v16  ;;  %vm4123_vm13 = vmor %vm1215_vm11, %vm1216_vm10 }
 0x43a   :  { %v1997_v22 = vpop.permute.xlu1 %1996  ;;  %v1888_v62 = vmul.f32 %v3008_v5, %v1887_v45  ;;  %v1227_v11 = vsub.f32 1.0, %v1226_v3  ;;  %v1241_v24 = vmul.f32 %v4099_v4, %v4054_v37  ;;  %v1234_v41 = vand.u32 2147483647, %v4036_v38 }
 0x43b   :  { %v1213_v8 = vmul.f32 %v4046_v6, %v1212_v14  ;;  %v2044_v17 = vmul.f32 %v1997_v22, %v1964_v26  ;;  %v1257_v25 = vsub.f32 1.0, %v1256_v61  ;;  %v1236_v52 = vand.u32 2147483648, %v4036_v38 }
 0x43c   :  { %v1889_v0 = vadd.f32 %v3008_v5, %v1888_v62  ;;  %v1228_v53 = vmul.f32 %v4064_v16, %v1227_v11  ;;  %v1242_v9 = vsub.f32 1.0, %v1241_v24  ;;  %vm1230_vm14 = vweird.f32 %v4036_v38 }
 0x43d   :  { %v3018_v23 = vpop.eup %3017  ;;  %v1258_v50 = vmul.f32 %v4095_v58, %v1257_v25  ;;  %v1222_v43 = vor.u32 1.1754944e-38, %v1221_v12  ;;  %vm1232_vm15 = vmor %vm1230_vm14, %vm1231_vm12  ;;  %vm1220_vm2 = vcmp.eq.f32.partialorder %v1219_v40, 8.507059e+37  ;;  %vm1235_vm3 = vcmp.eq.f32.partialorder %v1234_v41, 8.507059e+37 }
 0x43e   :  { %v1893_v10 = vsel %vm1892_vm7, %v3008_v5, %v1889_v0  ;;  %v1214_v5 = vadd.f32 %v4046_v6, %v1213_v8  ;;  %v1923_v2 = vpop.permute.xlu2 %1922  ;;  %v1229_v54 = vadd.f32 %v4064_v16, %v1228_v53  ;;  %v3020_v22 = vpop.eup %3019  ;;  %v1243_v63 = vmul.f32 %v4099_v4, %v1242_v9 }
 0x43f   :  { %v1898_v19 = vsel %vm1895_vm8, %v1897_v15, %v1893_v10  ;;  %v4136_v29 = vadd.f32 1.0, %v3018_v23  ;;  %v1237_v46 = vor.u32 1.1754944e-38, %v1236_v52  ;;  %vm1245_vm4 = vweird.f32 %v4054_v37 }
 0x440   :  { %2026 = vrot.lane.b32.xlu1 %v1898_v19, %s3177_s4  ;;  %v1218_v18 = vsel %vm4123_vm13, %v4046_v6, %v1214_v5  ;;  %v1233_v62 = vsel %vm1232_vm15, %v4064_v16, %v1229_v54  ;;  %vm1246_vm5 = vweird.f32 %v4099_v4  ;;  %v1259_v38 = vadd.f32 %v4095_v58, %v1258_v50 }
 0x441   :  { %v1223_v56 = vsel %vm1220_vm2, %v1222_v43, %v1218_v18  ;;  %vm1261_vm6 = vweird.f32 %v4095_v58  ;;  %v4142_v6 = vadd.f32 1.0, %v3020_v22  ;;  %v1238_v35 = vsel %vm1235_vm3, %v1237_v46, %v1233_v62  ;;  %vm4166_vm9 = vmor %vm1245_vm4, %vm1246_vm5 }
 0x442   :  { %v1999_v1 = vpop.permute.xlu1 %1998  ;;  %vm1260_vm7 = vweird.f32 %v4048_v21  ;;  %v1266_v16 = vand.u32 2147483648, %v4048_v21  ;;  %v1966_v47 = vmul.f32 %v4093_v34, %v1223_v56  ;;  %v1967_v0 = vmul.f32 %v1923_v2, %v1238_v35 }
 0x443   :  { %v2045_v39 = vmul.f32 %v1999_v1, %v1965_v48  ;;  %v1244_v31 = vadd.f32 %v4099_v4, %v1243_v63  ;;  %v1264_v3 = vand.u32 2147483647, %v4048_v21  ;;  %3021 = vrcp.f32 %v4136_v29  ;;  %vm4153_vm8 = vmor %vm1260_vm7, %vm1261_vm6 }
 0x444   :  { %v2715_v27 = vmul.f32 -1.442695, %v3476_v28  ;;  %v1249_v15 = vand.u32 2147483647, %v4054_v37  ;;  %v1251_v14 = vand.u32 2147483648, %v4054_v37  ;;  %v1263_v21 = vsel %vm4153_vm8, %v4095_v58, %v1259_v38 }
 0x445   :  { %v4108_v7 = vpack.c.bf16 %v2045_v39, %v2044_v17  ;;  %v2716_v34 = vmul.f32 -1.442695, %v3479_v30  ;;  %3023 = vrcp.f32 %v4142_v6  ;;  %v1267_v59 = vor.u32 1.1754944e-38, %v1266_v16 }
 0x446   :  { %v1925_v20 = vpop.permute.xlu2 %1924  ;;  %v1248_v30 = vsel %vm4166_vm9, %v4099_v4, %v1244_v31  ;;  %vm1265_vm0 = vcmp.eq.f32.partialorder %v1264_v3, 8.507059e+37  ;;  %3025 = vpow2.f32 %v2715_v27  ;;  %v1252_v58 = vor.u32 1.1754944e-38, %v1251_v14 }
 0x447   :  { %2755 = vmatmul.msk.bf16.vlgmr.msrb.gmra.mxu2 %vm782_vm1, %v4108_v7  ;;  %2763 = vmatmul.msk.bf16.vlgmr.msra.gmra.mxu3 %vm782_vm1, %v4108_v7  ;;  %v1268_v11 = vsel %vm1265_vm0, %v1267_v59, %v1263_v21  ;;  %3027 = vpow2.f32 %v2716_v34  ;;  %vm1250_vm10 = vcmp.eq.f32.partialorder %v1249_v15, 8.507059e+37  ;;  %v2718_v4 = vmul.f32 -1.442695, %v3487_v44 }
 0x448   :  { %2771 = vmatmul.msk.bf16.vlgmr.msra.gmra.mxu0 %vm782_vm1, %v4108_v7  ;;  %v1253_v8 = vsel %vm1250_vm10, %v1252_v58, %v1248_v30  ;;  %v2717_v61 = vmul.f32 -1.442695, %v3484_v36  ;;  %v1281_v43 = vand.u32 2147483648, %v4136_v29  ;;  %vm1275_vm12 = vweird.f32 %v4136_v29 }
 0x449   :  { %v3022_v37 = vpop.eup %3021  ;;  %v1968_v1 = vmul.f32 %v1925_v20, %v1253_v8  ;;  %3029 = vpow2.f32 %v2718_v4  ;;  %v1279_v62 = vand.u32 2147483647, %v4136_v29  ;;  %v1296_v38 = vand.u32 2147483648, %v4142_v6 }
 0x44a   :  { %v2001_v45 = vpop.permute.xlu0 %2000  ;;  %v1271_v24 = vmul.f32 %v3022_v37, %v4136_v29  ;;  %3031 = vpow2.f32 %v2717_v61  ;;  %vm1276_vm11 = vweird.f32 %v3022_v37  ;;  %vm1290_vm15 = vweird.f32 %v4142_v6 }
 0x44b   :  { %v2046_v19 = vmul.f32 %v2001_v45, %v1966_v47  ;;  %v3024_v32 = vpop.eup %3023  ;;  %vm1277_vm14 = vmor %vm1275_vm12, %vm1276_vm11  ;;  %v1294_v16 = vand.u32 2147483647, %v4142_v6  ;;  %v1282_v47 = vor.u32 1.1754944e-38, %v1281_v43  ;;  %vm1280_vm3 = vcmp.eq.f32.partialorder %v1279_v62, 8.507059e+37 }
 0x44c   :  { %v3026_v25 = vpop.eup %3025  ;;  %v1286_v40 = vmul.f32 %v3024_v32, %v4142_v6  ;;  %v1272_v44 = vsub.f32 1.0, %v1271_v24  ;;  %vm1291_vm13 = vweird.f32 %v3024_v32  ;;  %v1297_v15 = vor.u32 1.1754944e-38, %v1296_v38 }
 0x44d   :  { %v3028_v12 = vpop.eup %3027  ;;  %v4187_v54 = vadd.f32 1.0, %v3026_v25  ;;  %vm1292_vm2 = vmor %vm1290_vm15, %vm1291_vm13  ;;  %vm1295_vm4 = vcmp.eq.f32.partialorder %v1294_v16, 8.507059e+37  ;;  %v2719_v34 = vmul.f32 -1.442695, %v3492_v49  ;;  %v2720_v59 = vmul.f32 -1.442695, %v3495_v51 }
 0x44e   :  { %v2007_v17 = vpop.permute.xlu2 %2006  ;;  %v4189_v9 = vadd.f32 1.0, %v3028_v12  ;;  %v1287_v42 = vsub.f32 1.0, %v1286_v40  ;;  %v1273_v36 = vmul.f32 %v3022_v37, %v1272_v44 }
 0x44f   :  { %v3030_v41 = vpop.eup %3029  ;;  %3033 = vrcp.f32 %v4187_v54  ;;  %vm1305_vm7 = vweird.f32 %v4187_v54 }
 0x450   :  { %3035 = vrcp.f32 %v4189_v9  ;;  %v3032_v52 = vpop.eup %3031  ;;  %v1288_v45 = vmul.f32 %v3024_v32, %v1287_v42  ;;  %v4193_v23 = vadd.f32 1.0, %v3030_v41  ;;  %v1274_v18 = vadd.f32 %v3022_v37, %v1273_v36 }
 0x451   :  { %v4199_v50 = vadd.f32 1.0, %v3032_v52  ;;  %v1324_v61 = vand.u32 2147483647, %v4189_v9  ;;  %vm1320_vm8 = vweird.f32 %v4189_v9 }
 0x452   :  { %v2003_v10 = vpop.permute.xlu1 %2002  ;;  %v1927_v13 = vpop.permute.xlu0 %1926  ;;  %v1289_v63 = vadd.f32 %v3024_v32, %v1288_v45  ;;  %3037 = vrcp.f32 %v4193_v23  ;;  %v1278_v35 = vsel %vm1277_vm14, %v3022_v37, %v1274_v18  ;;  %vm1350_vm15 = vweird.f32 %v4193_v23 }
 0x453   :  { %v2047_v60 = vmul.f32 %v2003_v10, %v1967_v0  ;;  %v1969_v48 = vmul.f32 %v1927_v13, %v1268_v11  ;;  %3039 = vrcp.f32 %v4199_v50  ;;  %v1283_v27 = vsel %vm1280_vm3, %v1282_v47, %v1278_v35 }
 0x454   :  { %v1293_v31 = vsel %vm1292_vm2, %v3024_v32, %v1289_v63  ;;  %3041 = vpow2.f32 %v2719_v34  ;;  %vm1325_vm11 = vcmp.eq.f32.partialorder %v1324_v61, 8.507059e+37  ;;  %vm1335_vm12 = vweird.f32 %v4199_v50 }
 0x455   :  { %v4173_v26 = vpack.c.bf16 %v2047_v60, %v2046_v19  ;;  %v2049_v53 = vmul.f32 %v2007_v17, %v1969_v48  ;;  %v4204_v22 = vpop.eup %3033  ;;  %v1298_v6 = vsel %vm1295_vm4, %v1297_v15, %v1293_v31  ;;  %3043 = vpow2.f32 %v2720_v59 }
 0x456   :  { %v4208_v56 = vpop.eup %3035  ;;  %v1301_v29 = vmul.f32 %v4204_v22, %v4187_v54  ;;  %v2009_v3 = vpop.permute.xlu2 %2008  ;;  %vm1306_vm5 = vweird.f32 %v4204_v22  ;;  %v1356_v62 = vand.u32 2147483648, %v4193_v23  ;;  %v1354_v38 = vand.u32 2147483647, %v4193_v23 }
 0x457   :  { %2756 = vmatmul.msk.bf16.gmra.mxu2 %vm782_vm1, %v4173_v26  ;;  %2764 = vmatmul.msk.bf16.gmra.mxu3 %vm782_vm1, %v4173_v26  ;;  %v1316_v0 = vmul.f32 %v4208_v56, %v4189_v9  ;;  %vm1321_vm6 = vweird.f32 %v4208_v56  ;;  %vm1307_vm9 = vmor %vm1305_vm7, %vm1306_vm5  ;;  %v2721_v35 = vmul.f32 -1.442695, %v3500_v57  ;;  %v1339_v16 = vand.u32 2147483647, %v4199_v50 }
 0x458   :  { %2772 = vmatmul.msk.bf16.gmra.mxu0 %vm782_vm1, %v4173_v26  ;;  %v4219_v55 = vpop.eup %3037  ;;  %v1302_v10 = vsub.f32 1.0, %v1301_v29  ;;  %vm4250_vm0 = vmor %vm1320_vm8, %vm1321_vm6  ;;  %v1341_v47 = vand.u32 2147483648, %v4199_v50  ;;  %vm1355_vm4 = vcmp.eq.f32.partialorder %v1354_v38, 8.507059e+37 }
 0x459   :  { %v1317_v19 = vsub.f32 1.0, %v1316_v0  ;;  %v4222_v60 = vpop.eup %3039  ;;  %v1346_v58 = vmul.f32 %v4219_v55, %v4193_v23  ;;  %vm1351_vm14 = vweird.f32 %v4219_v55  ;;  %vm1340_vm5 = vcmp.eq.f32.partialorder %v1339_v16, 8.507059e+37 }
 0x45a   :  { %v2005_v39 = vpop.permute.xlu1 %2004  ;;  %v1929_v46 = vpop.permute.xlu0 %1928  ;;  %v1303_v11 = vmul.f32 %v4204_v22, %v1302_v10  ;;  %v1331_v49 = vmul.f32 %v4222_v60, %v4199_v50  ;;  %vm1336_vm13 = vweird.f32 %v4222_v60  ;;  %vm4275_vm2 = vmor %vm1350_vm15, %vm1351_vm14 }
 0x45b   :  { %v2048_v5 = vmul.f32 %v2005_v39, %v1968_v1  ;;  %v1970_v20 = vmul.f32 %v1929_v46, %v1283_v27  ;;  %v1318_v48 = vmul.f32 %v4208_v56, %v1317_v19  ;;  %v1347_v51 = vsub.f32 1.0, %v1346_v58  ;;  %v3042_v25 = vpop.eup %3041  ;;  %vm4288_vm3 = vmor %vm1335_vm12, %vm1336_vm13 }
 0x45c   :  { %v1304_v4 = vadd.f32 %v4204_v22, %v1303_v11  ;;  %v1309_v1 = vand.u32 2147483647, %v4187_v54  ;;  %v1332_v17 = vsub.f32 1.0, %v1331_v49  ;;  %v1311_v39 = vand.u32 2147483648, %v4187_v54  ;;  %v3044_v42 = vpop.eup %3043 }
 0x45d   :  { %v4184_v2 = vpack.c.bf16 %v2049_v53, %v2048_v5  ;;  %v2050_v13 = vmul.f32 %v2009_v3, %v1970_v20  ;;  %v1319_v32 = vadd.f32 %v4208_v56, %v1318_v48  ;;  %v1326_v53 = vand.u32 2147483648, %v4189_v9 }
 0x45e   :  { %v1935_v8 = vpop.permute.xlu2 %1934  ;;  %v1348_v12 = vmul.f32 %v4219_v55, %v1347_v51  ;;  %v1308_v44 = vsel %vm1307_vm9, %v4204_v22, %v1304_v4  ;;  %v1333_v54 = vmul.f32 %v4222_v60, %v1332_v17  ;;  %vm1310_vm10 = vcmp.eq.f32.partialorder %v1309_v1, 8.507059e+37 }
 0x45f   :  { %v1323_v41 = vsel %vm4250_vm0, %v4208_v56, %v1319_v32  ;;  %v1312_v36 = vor.u32 1.1754944e-38, %v1311_v39  ;;  %v4259_v52 = vadd.f32 1.0, %v3042_v25  ;;  %v1327_v9 = vor.u32 1.1754944e-38, %v1326_v53 }
 0x460   :  { %v1349_v18 = vadd.f32 %v4219_v55, %v1348_v12  ;;  %v4265_v43 = vadd.f32 1.0, %v3044_v42  ;;  %v1334_v56 = vadd.f32 %v4222_v60, %v1333_v54  ;;  %v2722_v3 = vmul.f32 -1.442695, %v3503_v33 }
 0x461   :  { %v1313_v45 = vsel %vm1310_vm10, %v1312_v36, %v1308_v44  ;;  %v1328_v22 = vsel %vm1325_vm11, %v1327_v9, %v1323_v41  ;;  %3045 = vrcp.f32 %v4259_v52  ;;  %v1371_v53 = vand.u32 2147483648, %v4259_v52 }
 0x462   :  { %v1931_v14 = vpop.permute.xlu1 %1930  ;;  %v1973_v63 = vmul.f32 %v1935_v8, %v1328_v22  ;;  %v1353_v23 = vsel %vm4275_vm2, %v4219_v55, %v1349_v18  ;;  %3047 = vrcp.f32 %v4265_v43  ;;  %v1338_v33 = vsel %vm4288_vm3, %v4222_v60, %v1334_v56 }
 0x463   :  { %v1971_v21 = vmul.f32 %v1931_v14, %v1298_v6  ;;  %v1357_v14 = vor.u32 1.1754944e-38, %v1356_v62  ;;  %3049 = vpow2.f32 %v2721_v35  ;;  %v1342_v55 = vor.u32 1.1754944e-38, %v1341_v47 }
 0x464   :  { %3051 = vpow2.f32 %v2722_v3  ;;  %vm1365_vm7 = vweird.f32 %v4259_v52  ;;  %v1386_v44 = vand.u32 2147483648, %v4265_v43  ;;  %vm1380_vm0 = vweird.f32 %v4265_v43 }
 0x465   :  { %v1358_v10 = vsel %vm1355_vm4, %v1357_v14, %v1353_v23  ;;  %v1343_v19 = vsel %vm1340_vm5, %v1342_v55, %v1338_v33  ;;  %v1384_v41 = vand.u32 2147483647, %v4265_v43  ;;  %v1372_v54 = vor.u32 1.1754944e-38, %v1371_v53 }
 0x466   :  { %v1937_v29 = vpop.permute.xlu2 %1936  ;;  %v1387_v18 = vor.u32 1.1754944e-38, %v1386_v44 }
 0x467   :  { %2757 = vmatmul.msk.bf16.gmra.mxu2 %vm782_vm1, %v4184_v2  ;;  %2765 = vmatmul.msk.bf16.gmra.mxu3 %vm782_vm1, %v4184_v2  ;;  %v3046_v50 = vpop.eup %3045  ;;  %vm1385_vm12 = vcmp.eq.f32.partialorder %v1384_v41, 8.507059e+37 }
 0x468   :  { %2773 = vmatmul.msk.bf16.gmra.mxu0 %vm782_vm1, %v4184_v2  ;;  %v3048_v60 = vpop.eup %3047  ;;  %vm1366_vm6 = vweird.f32 %v3046_v50 }
 0x469   :  { %v3050_v11 = vpop.eup %3049  ;;  %v1376_v51 = vmul.f32 %v3048_v60, %v4265_v43  ;;  %vm1381_vm8 = vweird.f32 %v3048_v60  ;;  %vm1367_vm9 = vmor %vm1365_vm7, %vm1366_vm6 }
 0x46a   :  { %v1933_v24 = vpop.permute.xlu1 %1932  ;;  %v3052_v48 = vpop.eup %3051  ;;  %v4307_v8 = vadd.f32 1.0, %v3050_v11  ;;  %vm1382_vm10 = vmor %vm1380_vm0, %vm1381_vm8 }
 0x46b   :  { %v1972_v46 = vmul.f32 %v1933_v24, %v1313_v45  ;;  %v4309_v1 = vadd.f32 1.0, %v3052_v48  ;;  %v1377_v32 = vsub.f32 1.0, %v1376_v51  ;;  %v3057_v51 = vld [vmem:[#allocation2 + $0x10] sm:$0xff] }
 0x46c   :  { %3053 = vrcp.f32 %v4307_v8  ;;  %vm1395_vm15 = vweird.f32 %v4307_v8 }
 0x46d   :  { %3055 = vrcp.f32 %v4309_v1  ;;  %v1378_v39 = vmul.f32 %v3048_v60, %v1377_v32  ;;  %v1416_v23 = vand.u32 2147483648, %v4309_v1  ;;  %vm1410_vm2 = vweird.f32 %v4309_v1  ;;  %v3058_v32 = vld [vmem:[#allocation2] sm:$0xff] }
 0x46e   :  { %v1414_v14 = vand.u32 2147483647, %v4309_v1 }
 0x46f   :  { %v1379_v25 = vadd.f32 %v3048_v60, %v1378_v39  ;;  %v3059_v39 = vld [vmem:[#allocation2 + $0x8] sm:$0xff] }
 0x470   :  { %vm1415_vm5 = vcmp.eq.f32.partialorder %v1414_v14, 8.507059e+37  ;;  %v3071_v14 = vld [vmem:[#allocation2 + $0x88] sm:$0xff] }
 0x471   :  { %v1383_v9 = vsel %vm1382_vm10, %v3048_v60, %v1379_v25 }
 0x472   :  { %v2011_v28 = vpop.permute.xlu0 %2010  ;;  %v3054_v24 = vpop.eup %3053 }
 0x473   :  { %v2051_v30 = vmul.f32 %v2011_v28, %v1971_v21  ;;  %v1974_v21 = vmul.f32 %v1937_v29, %v1343_v19  ;;  %v3056_v12 = vpop.eup %3055  ;;  %vm1396_vm13 = vweird.f32 %v3054_v24 }
 0x474   :  { %v1406_v36 = vmul.f32 %v3056_v12, %v4309_v1  ;;  %vm1411_vm14 = vweird.f32 %v3056_v12  ;;  %vm1397_vm3 = vmor %vm1395_vm15, %vm1396_vm13 }
 0x475   :  { %v4231_v37 = vpack.c.bf16 %v2051_v30, %v2050_v13  ;;  %v1361_v30 = vmul.f32 %v3046_v50, %v4259_v52  ;;  %vm1412_vm4 = vmor %vm1410_vm2, %vm1411_vm14 }
 0x476   :  { %v1407_v56 = vsub.f32 1.0, %v1406_v36 }
 0x477   :  { %2758 = vmatmul.msk.bf16.gmra.mxu2 %vm782_vm1, %v4231_v37  ;;  %2766 = vmatmul.msk.bf16.gmra.mxu3 %vm782_vm1, %v4231_v37  ;;  %v1362_v4 = vsub.f32 1.0, %v1361_v30 }
 0x478   :  { %2774 = vmatmul.msk.bf16.gmra.mxu0 %vm782_vm1, %v4231_v37  ;;  %v1408_v29 = vmul.f32 %v3056_v12, %v1407_v56  ;;  %v3066_v56 = vld [vmem:[#allocation2 + $0x70] sm:$0xff] }
 0x479   :  { %v1363_v17 = vmul.f32 %v3046_v50, %v1362_v4 }
 0x47a   :  { %v2013_v5 = vpop.permute.xlu0 %2012  ;;  %v2019_v28 = vpop.permute.xlu2 %2018  ;;  %v1409_v3 = vadd.f32 %v3056_v12, %v1408_v29 }
 0x47b   :  { %v2052_v27 = vmul.f32 %v2013_v5, %v1972_v46  ;;  %v1364_v61 = vadd.f32 %v3046_v50, %v1363_v17  ;;  %v1369_v5 = vand.u32 2147483647, %v4259_v52  ;;  %v1391_v52 = vmul.f32 %v3054_v24, %v4307_v8 }
 0x47c   :  { %v1413_v33 = vsel %vm1412_vm4, %v3056_v12, %v1409_v3 }
 0x47d   :  { %v1368_v42 = vsel %vm1367_vm9, %v3046_v50, %v1364_v61  ;;  %vm1370_vm11 = vcmp.eq.f32.partialorder %v1369_v5, 8.507059e+37  ;;  %v1392_v38 = vsub.f32 1.0, %v1391_v52 }
 0x47e   :  { %v1373_v45 = vsel %vm1370_vm11, %v1372_v54, %v1368_v42  ;;  %v3062_v42 = vld [vmem:[#allocation2 + $0x28] sm:$0xff]  ;;  %v3063_v54 = vld [vmem:[#allocation2 + $0x50] sm:$0xff] }
 0x47f   :  { %v1393_v0 = vmul.f32 %v3054_v24, %v1392_v38 }
 0x482   :  { %v2015_v31 = vpop.permute.xlu1 %2014  ;;  %v1939_v20 = vpop.permute.xlu0 %1938 }
 0x483   :  { %v2053_v15 = vmul.f32 %v2015_v31, %v1973_v63  ;;  %v1975_v34 = vmul.f32 %v1939_v20, %v1358_v10  ;;  %v1388_v63 = vsel %vm1385_vm12, %v1387_v18, %v1383_v9  ;;  %v2021_v35 = vpop.permute.xlu2 %2020  ;;  %v1399_v20 = vand.u32 2147483647, %v4307_v8 }
 0x484   :  { %v1417_v10 = vor.u32 1.1754944e-38, %v1416_v23 }
 0x485   :  { %v4295_v6 = vpack.c.bf16 %v2053_v15, %v2052_v27  ;;  %v2055_v13 = vmul.f32 %v2019_v28, %v1975_v34  ;;  %v1394_v27 = vadd.f32 %v3054_v24, %v1393_v0  ;;  %v1401_v15 = vand.u32 2147483648, %v4307_v8  ;;  %v3069_v0 = vld [vmem:[#allocation2 + $0x90] sm:$0xff] }
 0x486   :  { %vm1400_vm6 = vcmp.eq.f32.partialorder %v1399_v20, 8.507059e+37  ;;  %v1418_v19 = vsel %vm1415_vm5, %v1417_v10, %v1413_v33 }
 0x487   :  { %2759 = vmatmul.msk.bf16.gmra.mxu2 %vm782_vm1, %v4295_v6  ;;  %2767 = vmatmul.msk.bf16.gmra.mxu3 %vm782_vm1, %v4295_v6  ;;  %v1398_v55 = vsel %vm1397_vm3, %v3054_v24, %v1394_v27  ;;  %v1402_v50 = vor.u32 1.1754944e-38, %v1401_v15  ;;  %v3060_v24 = vld [vmem:[#allocation2 + $0x30] sm:$0xff]  ;;  %v3070_v15 = vld [vmem:[#allocation2 + $0x80] sm:$0xff] }
 0x488   :  { %2775 = vmatmul.msk.bf16.gmra.mxu0 %vm782_vm1, %v4295_v6 }
 0x48a   :  { %v2017_v59 = vpop.permute.xlu1 %2016  ;;  %v1941_v40 = vpop.permute.xlu0 %1940 }
 0x48b   :  { %v2054_v58 = vmul.f32 %v2017_v59, %v1974_v21  ;;  %v1976_v62 = vmul.f32 %v1941_v40, %v1373_v45  ;;  %v1947_v34 = vpop.permute.xlu2 %1946  ;;  %v1403_v21 = vsel %vm1400_vm6, %v1402_v50, %v1398_v55  ;;  %v3061_v40 = vld [vmem:[#allocation2 + $0x20] sm:$0xff]  ;;  %v3072_v55 = vld [vmem:[#allocation2 + $0xb0] sm:$0xff] }
 0x48c   :  { %v1979_v28 = vmul.f32 %v1947_v34, %v1418_v19  ;;  %v3064_v45 = vld [vmem:[#allocation2 + $0x40] sm:$0xff] }
 0x48d   :  { %v4304_v49 = vpack.c.bf16 %v2055_v13, %v2054_v58  ;;  %v2056_v43 = vmul.f32 %v2021_v35, %v1976_v62  ;;  %v3073_v19 = vld [vmem:[#allocation2 + $0xa0] sm:$0xff] }
 0x492   :  { %v1943_v22 = vpop.permute.xlu1 %1942 }
 0x493   :  { %v1977_v46 = vmul.f32 %v1943_v22, %v1388_v63  ;;  %v3065_v22 = vld [vmem:[#allocation2 + $0x48] sm:$0xff] }
 0x497   :  { %2760 = vmatmul.msk.bf16.gmra.mxu2 %vm782_vm1, %v4304_v49  ;;  %2768 = vmatmul.msk.bf16.gmra.mxu3 %vm782_vm1, %v4304_v49 }
 0x498   :  { %2776 = vmatmul.msk.bf16.gmra.mxu0 %vm782_vm1, %v4304_v49 }
 0x49a   :  { %v1945_v57 = vpop.permute.xlu1 %1944 }
 0x49b   :  { %v1978_v59 = vmul.f32 %v1945_v57, %v1403_v21 }
 0x4a2   :  { %v2023_v16 = vpop.permute.xlu0 %2022 }
 0x4a3   :  { %v2057_v47 = vmul.f32 %v2023_v16, %v1977_v46  ;;  %v3067_v16 = vld [vmem:[#allocation2 + $0x60] sm:$0xff] }
 0x4a5   :  { %v4327_v31 = vpack.c.bf16 %v2057_v47, %v2056_v43  ;;  %v3068_v47 = vld [vmem:[#allocation2 + $0x68] sm:$0xff] }
 0x4a7   :  { %2761 = vmatmul.msk.bf16.gmra.mxu2 %vm782_vm1, %v4327_v31  ;;  %2769 = vmatmul.msk.bf16.gmra.mxu3 %vm782_vm1, %v4327_v31 }
 0x4a8   :  { %2777 = vmatmul.msk.bf16.gmra.mxu0 %vm782_vm1, %v4327_v31 }
 0x4aa   :  { %v2025_v60 = vpop.permute.xlu0 %2024 }
 0x4ab   :  { %v2058_v30 = vmul.f32 %v2025_v60, %v1978_v59  ;;  %v3074_v60 = vld [vmem:[#allocation2 + $0xa8] sm:$0xff]  ;;  %v3075_v59 = vld [vmem:[#allocation2 + $0xd0] sm:$0xff] }
 0x4b2   :  { %v2027_v13 = vpop.permute.xlu1 %2026 }
 0x4b3   :  { %v2059_v58 = vmul.f32 %v2027_v13, %v1979_v28 }
 0x4b5   :  { %v4341_v11 = vpack.c.bf16 %v2059_v58, %v2058_v30 }
 0x4b7   :  { %2762 = vmatmul.msk.bf16.gmra.mxu2 %vm782_vm1, %v4341_v11  ;;  %2770 = vmatmul.msk.bf16.gmra.mxu3 %vm782_vm1, %v4341_v11 }
 0x4b8   :  { %2778 = vmatmul.msk.bf16.gmra.mxu0 %vm782_vm1, %v4341_v11 }
 0x4c5   :  { %v2223_v48 = vpop.f32.mrf.mxu0 }
 0x4c6   :  { %v2314_v8 = vmul.f32 %v3057_v51, %v2223_v48  ;;  %v3076_v48 = vld [vmem:[#allocation2 + $0xc0] sm:$0xff] }
 0x4c7   :  { %2779 = vmatmul.msk.bf16.vlgmr.msra.gmra.mxu2 %vm782_vm1, %v4108_v7 }
 0x4c8   :  { %2378 = vst [vmem:[#allocation5 + $0x10] sm:$0xff] %v2314_v8  ;;  %v3077_v8 = vld [vmem:[#allocation2 + $0xc8] sm:$0xff] }
 0x4ca   :  { %v2125_v4 = vpop.f32.mrf.mxu2  ;;  %v2174_v1 = vpop.f32.mrf.mxu3 }
 0x4cb   :  { %v2312_v17 = vmul.f32 %v3058_v32, %v2125_v4  ;;  %v2313_v61 = vmul.f32 %v3059_v39, %v2174_v1  ;;  %v3078_v32 = vld [vmem:[#allocation2 + $0xf0] sm:$0xff] }
 0x4cd   :  { %2376 = vst [vmem:[#allocation5] sm:$0xff] %v2312_v17  ;;  %v2225_v53 = vpop.f32.mrf.mxu0 }
 0x4ce   :  { %2377 = vst [vmem:[#allocation5 + $0x8] sm:$0xff] %v2313_v61  ;;  %v2318_v5 = vmul.f32 %v3060_v24, %v2225_v53  ;;  %v3079_v53 = vld [vmem:[#allocation2 + $0xe0] sm:$0xff] }
 0x4d0   :  { %2382 = vst [vmem:[#allocation5 + $0x30] sm:$0xff] %v2318_v5  ;;  %v3080_v5 = vld [vmem:[#allocation2 + $0xe8] sm:$0xff] }
 0x4d2   :  { %v2127_v25 = vpop.f32.mrf.mxu2  ;;  %v2176_v12 = vpop.f32.mrf.mxu3 }
 0x4d3   :  { %v2316_v44 = vmul.f32 %v3061_v40, %v2127_v25  ;;  %v2317_v41 = vmul.f32 %v3062_v42, %v2176_v12  ;;  %v3081_v12 = vld [vmem:[#allocation2 + $0x110] sm:$0xff] }
 0x4d5   :  { %2380 = vst [vmem:[#allocation5 + $0x20] sm:$0xff] %v2316_v44  ;;  %v2228_v7 = vpop.f32.mrf.mxu0 }
 0x4d6   :  { %2381 = vst [vmem:[#allocation5 + $0x28] sm:$0xff] %v2317_v41  ;;  %v2322_v36 = vmul.f32 %v3063_v54, %v2228_v7  ;;  %v3082_v41 = vld [vmem:[#allocation2 + $0x100] sm:$0xff]  ;;  %v3083_v54 = vld [vmem:[#allocation2 + $0x108] sm:$0xff] }
 0x4d7   :  { %2780 = vmatmul.msk.bf16.gmra.mxu2 %vm782_vm1, %v4173_v26 }
 0x4d8   :  { %2386 = vst [vmem:[#allocation5 + $0x50] sm:$0xff] %v2322_v36 }
 0x4da   :  { %v2130_v9 = vpop.f32.mrf.mxu2  ;;  %v2179_v52 = vpop.f32.mrf.mxu3 }
 0x4db   :  { %v2320_v18 = vmul.f32 %v3064_v45, %v2130_v9  ;;  %v2321_v62 = vmul.f32 %v3065_v22, %v2179_v52  ;;  %v3084_v52 = vld [vmem:[#allocation2 + $0x130] sm:$0xff] }
 0x4dd   :  { %2384 = vst [vmem:[#allocation5 + $0x40] sm:$0xff] %v2320_v18  ;;  %v2230_v63 = vpop.f32.mrf.mxu0 }
 0x4de   :  { %2385 = vst [vmem:[#allocation5 + $0x48] sm:$0xff] %v2321_v62  ;;  %v2326_v46 = vmul.f32 %v3066_v56, %v2230_v63  ;;  %v3085_v62 = vld [vmem:[#allocation2 + $0x120] sm:$0xff]  ;;  %v3086_v56 = vld [vmem:[#allocation2 + $0x128] sm:$0xff] }
 0x4e0   :  { %2390 = vst [vmem:[#allocation5 + $0x70] sm:$0xff] %v2326_v46 }
 0x4e2   :  { %v2132_v38 = vpop.f32.mrf.mxu2  ;;  %v2181_v35 = vpop.f32.mrf.mxu3 }
 0x4e3   :  { %v2324_v43 = vmul.f32 %v3067_v16, %v2132_v38  ;;  %v2325_v29 = vmul.f32 %v3068_v47, %v2181_v35  ;;  %v3087_v38 = vld [vmem:[#allocation2 + $0x150] sm:$0xff]  ;;  %v3088_v47 = vld [vmem:[#allocation2 + $0x140] sm:$0xff] }
 0x4e5   :  { %2388 = vst [vmem:[#allocation5 + $0x60] sm:$0xff] %v2324_v43  ;;  %v2233_v26 = vpop.f32.mrf.mxu0 }
 0x4e6   :  { %2389 = vst [vmem:[#allocation5 + $0x68] sm:$0xff] %v2325_v29  ;;  %v2330_v3 = vmul.f32 %v3069_v0, %v2233_v26  ;;  %v3089_v26 = vld [vmem:[#allocation2 + $0x148] sm:$0xff] }
 0x4e7   :  { %2781 = vmatmul.msk.bf16.gmra.mxu2 %vm782_vm1, %v4184_v2 }
 0x4e8   :  { %2394 = vst [vmem:[#allocation5 + $0x90] sm:$0xff] %v2330_v3 }
 0x4ea   :  { %v2135_v27 = vpop.f32.mrf.mxu2  ;;  %v2184_v23 = vpop.f32.mrf.mxu3 }
 0x4eb   :  { %v2328_v57 = vmul.f32 %v3070_v15, %v2135_v27  ;;  %v2329_v20 = vmul.f32 %v3071_v14, %v2184_v23  ;;  %v3090_v27 = vld [vmem:[#allocation2 + $0x170] sm:$0xff]  ;;  %v3091_v14 = vld [vmem:[#allocation2 + $0x160] sm:$0xff] }
 0x4ed   :  { %2392 = vst [vmem:[#allocation5 + $0x80] sm:$0xff] %v2328_v57  ;;  %v2235_v33 = vpop.f32.mrf.mxu0 }
 0x4ee   :  { %2393 = vst [vmem:[#allocation5 + $0x88] sm:$0xff] %v2329_v20  ;;  %v2334_v10 = vmul.f32 %v3072_v55, %v2235_v33  ;;  %v3092_v33 = vld [vmem:[#allocation2 + $0x168] sm:$0xff] }
 0x4f0   :  { %2398 = vst [vmem:[#allocation5 + $0xb0] sm:$0xff] %v2334_v10  ;;  %v3093_v10 = vld [vmem:[#allocation2 + $0x190] sm:$0xff] }
 0x4f2   :  { %v2137_v34 = vpop.f32.mrf.mxu2  ;;  %v2186_v50 = vpop.f32.mrf.mxu3 }
 0x4f3   :  { %v2332_v21 = vmul.f32 %v3073_v19, %v2137_v34  ;;  %v2333_v28 = vmul.f32 %v3074_v60, %v2186_v50 }
 0x4f5   :  { %2396 = vst [vmem:[#allocation5 + $0xa0] sm:$0xff] %v2332_v21  ;;  %v2238_v2 = vpop.f32.mrf.mxu0  ;;  %v3094_v21 = vld [vmem:[#allocation2 + $0x180] sm:$0xff] }
 0x4f6   :  { %2397 = vst [vmem:[#allocation5 + $0xa8] sm:$0xff] %v2333_v28  ;;  %v2338_v13 = vmul.f32 %v3075_v59, %v2238_v2  ;;  %v3095_v28 = vld [vmem:[#allocation2 + $0x188] sm:$0xff] }
 0x4f7   :  { %2782 = vmatmul.msk.bf16.gmra.mxu2 %vm782_vm1, %v4231_v37 }
 0x4f8   :  { %2402 = vst [vmem:[#allocation5 + $0xd0] sm:$0xff] %v2338_v13  ;;  %v3096_v13 = vld [vmem:[#allocation2 + $0x1b0] sm:$0xff] }
 0x4fa   :  { %v2140_v30 = vpop.f32.mrf.mxu2  ;;  %v2189_v58 = vpop.f32.mrf.mxu3 }
 0x4fb   :  { %v2336_v51 = vmul.f32 %v3076_v48, %v2140_v30  ;;  %v2337_v4 = vmul.f32 %v3077_v8, %v2189_v58 }
 0x4fd   :  { %2400 = vst [vmem:[#allocation5 + $0xc0] sm:$0xff] %v2336_v51  ;;  %v2240_v1 = vpop.f32.mrf.mxu0  ;;  %v3097_v51 = vld [vmem:[#allocation2 + $0x1a0] sm:$0xff] }
 0x4fe   :  { %2401 = vst [vmem:[#allocation5 + $0xc8] sm:$0xff] %v2337_v4  ;;  %v2342_v17 = vmul.f32 %v3078_v32, %v2240_v1  ;;  %v3098_v4 = vld [vmem:[#allocation2 + $0x1a8] sm:$0xff]  ;;  %v3099_v32 = vld [vmem:[#allocation2 + $0x1d0] sm:$0xff] }
 0x500   :  { %2406 = vst [vmem:[#allocation5 + $0xf0] sm:$0xff] %v2342_v17 }
 0x502   :  { %v2142_v39 = vpop.f32.mrf.mxu2  ;;  %v2191_v61 = vpop.f32.mrf.mxu3 }
 0x503   :  { %v2340_v24 = vmul.f32 %v3079_v53, %v2142_v39  ;;  %v2341_v25 = vmul.f32 %v3080_v5, %v2191_v61  ;;  %v3100_v53 = vld [vmem:[#allocation2 + $0x1c0] sm:$0xff]  ;;  %v3101_v5 = vld [vmem:[#allocation2 + $0x1c8] sm:$0xff] }
 0x505   :  { %2404 = vst [vmem:[#allocation5 + $0xe0] sm:$0xff] %v2340_v24  ;;  %v2243_v37 = vpop.f32.mrf.mxu0 }
 0x506   :  { %2405 = vst [vmem:[#allocation5 + $0xe8] sm:$0xff] %v2341_v25  ;;  %v2346_v40 = vmul.f32 %v3081_v12, %v2243_v37  ;;  %v3102_v12 = vld [vmem:[#allocation2 + $0x1f0] sm:$0xff] }
 0x507   :  { %2783 = vmatmul.msk.bf16.gmra.mxu2 %vm782_vm1, %v4295_v6 }
 0x508   :  { %2410 = vst [vmem:[#allocation5 + $0x110] sm:$0xff] %v2346_v40 }
 0x50a   :  { %v2145_v44 = vpop.f32.mrf.mxu2  ;;  %v2194_v42 = vpop.f32.mrf.mxu3 }
 0x50b   :  { %v2344_v7 = vmul.f32 %v3082_v41, %v2145_v44  ;;  %v2345_v36 = vmul.f32 %v3083_v54, %v2194_v42  ;;  %v3103_v41 = vld [vmem:[#allocation2 + $0x1e0] sm:$0xff]  ;;  %v3104_v54 = vld [vmem:[#allocation2 + $0x1e8] sm:$0xff] }
 0x50d   :  { %2408 = vst [vmem:[#allocation5 + $0x100] sm:$0xff] %v2344_v7  ;;  %v2245_v9 = vpop.f32.mrf.mxu0 }
 0x50e   :  { %2409 = vst [vmem:[#allocation5 + $0x108] sm:$0xff] %v2345_v36  ;;  %v2350_v45 = vmul.f32 %v3084_v52, %v2245_v9  ;;  %v3105_v9 = vld [vmem:[#allocation2 + $0x18] sm:$0xff] }
 0x510   :  { %2414 = vst [vmem:[#allocation5 + $0x130] sm:$0xff] %v2350_v45 }
 0x512   :  { %v2147_v18 = vpop.f32.mrf.mxu2  ;;  %v2196_v22 = vpop.f32.mrf.mxu3 }
 0x513   :  { %v2348_v63 = vmul.f32 %v3085_v62, %v2147_v18  ;;  %v2349_v46 = vmul.f32 %v3086_v56, %v2196_v22  ;;  %v3106_v18 = vld [vmem:[#allocation2 + $0x38] sm:$0xff] }
 0x515   :  { %2412 = vst [vmem:[#allocation5 + $0x120] sm:$0xff] %v2348_v63  ;;  %v2248_v6 = vpop.f32.mrf.mxu0  ;;  %v3107_v63 = vld [vmem:[#allocation2 + $0x58] sm:$0xff] }
 0x516   :  { %2413 = vst [vmem:[#allocation5 + $0x128] sm:$0xff] %v2349_v46  ;;  %v2354_v35 = vmul.f32 %v3087_v38, %v2248_v6  ;;  %v3108_v6 = vld [vmem:[#allocation2 + $0x78] sm:$0xff] }
 0x517   :  { %2784 = vmatmul.msk.bf16.gmra.mxu2 %vm782_vm1, %v4304_v49 }
 0x518   :  { %2418 = vst [vmem:[#allocation5 + $0x150] sm:$0xff] %v2354_v35 }
 0x51a   :  { %v2150_v16 = vpop.f32.mrf.mxu2  ;;  %v2199_v43 = vpop.f32.mrf.mxu3 }
 0x51b   :  { %v2352_v29 = vmul.f32 %v3088_v47, %v2150_v16  ;;  %v2353_v0 = vmul.f32 %v3089_v26, %v2199_v43  ;;  %v3109_v16 = vld [vmem:[#allocation2 + $0x98] sm:$0xff] }
 0x51d   :  { %2416 = vst [vmem:[#allocation5 + $0x140] sm:$0xff] %v2352_v29  ;;  %v2250_v3 = vpop.f32.mrf.mxu0  ;;  %v3110_v29 = vld [vmem:[#allocation2 + $0xb8] sm:$0xff] }
 0x51e   :  { %2417 = vst [vmem:[#allocation5 + $0x148] sm:$0xff] %v2353_v0  ;;  %v2358_v23 = vmul.f32 %v3090_v27, %v2250_v3  ;;  %v3111_v3 = vld [vmem:[#allocation2 + $0xd8] sm:$0xff] }
 0x520   :  { %2422 = vst [vmem:[#allocation5 + $0x170] sm:$0xff] %v2358_v23 }
 0x522   :  { %v2152_v15 = vpop.f32.mrf.mxu2  ;;  %v2201_v57 = vpop.f32.mrf.mxu3 }
 0x523   :  { %v2356_v20 = vmul.f32 %v3091_v14, %v2152_v15  ;;  %v2357_v55 = vmul.f32 %v3092_v33, %v2201_v57  ;;  %v3112_v15 = vld [vmem:[#allocation2 + $0xf8] sm:$0xff] }
 0x525   :  { %2420 = vst [vmem:[#allocation5 + $0x160] sm:$0xff] %v2356_v20  ;;  %v2253_v49 = vpop.f32.mrf.mxu0  ;;  %v3113_v20 = vld [vmem:[#allocation2 + $0x118] sm:$0xff] }
 0x526   :  { %2421 = vst [vmem:[#allocation5 + $0x168] sm:$0xff] %v2357_v55  ;;  %v2362_v34 = vmul.f32 %v3093_v10, %v2253_v49  ;;  %v3114_v49 = vld [vmem:[#allocation2 + $0x138] sm:$0xff] }
 0x527   :  { %2785 = vmatmul.msk.bf16.gmra.mxu2 %vm782_vm1, %v4327_v31 }
 0x528   :  { %2426 = vst [vmem:[#allocation5 + $0x190] sm:$0xff] %v2362_v34 }
 0x52a   :  { %v2155_v50 = vpop.f32.mrf.mxu2  ;;  %v2204_v19 = vpop.f32.mrf.mxu3 }
 0x52b   :  { %v2360_v60 = vmul.f32 %v3094_v21, %v2155_v50  ;;  %v2361_v2 = vmul.f32 %v3095_v28, %v2204_v19  ;;  %v3115_v50 = vld [vmem:[#allocation2 + $0x158] sm:$0xff] }
 0x52d   :  { %2424 = vst [vmem:[#allocation5 + $0x180] sm:$0xff] %v2360_v60  ;;  %v2255_v59 = vpop.f32.mrf.mxu0  ;;  %v3116_v60 = vld [vmem:[#allocation2 + $0x178] sm:$0xff] }
 0x52e   :  { %2425 = vst [vmem:[#allocation5 + $0x188] sm:$0xff] %v2361_v2  ;;  %v2366_v30 = vmul.f32 %v3096_v13, %v2255_v59  ;;  %v3117_v59 = vld [vmem:[#allocation2 + $0x198] sm:$0xff] }
 0x530   :  { %2430 = vst [vmem:[#allocation5 + $0x1b0] sm:$0xff] %v2366_v30 }
 0x532   :  { %v2157_v58 = vpop.f32.mrf.mxu2  ;;  %v2206_v48 = vpop.f32.mrf.mxu3 }
 0x533   :  { %v2364_v8 = vmul.f32 %v3097_v51, %v2157_v58  ;;  %v2365_v1 = vmul.f32 %v3098_v4, %v2206_v48  ;;  %v3118_v58 = vld [vmem:[#allocation2 + $0x1b8] sm:$0xff] }
 0x535   :  { %2428 = vst [vmem:[#allocation5 + $0x1a0] sm:$0xff] %v2364_v8  ;;  %v2258_v31 = vpop.f32.mrf.mxu0  ;;  %v3119_v8 = vld [vmem:[#allocation2 + $0x1d8] sm:$0xff] }
 0x536   :  { %2429 = vst [vmem:[#allocation5 + $0x1a8] sm:$0xff] %v2365_v1  ;;  %v2370_v17 = vmul.f32 %v3099_v32, %v2258_v31  ;;  %v3120_v31 = vld [vmem:[#allocation2 + $0x1f8] sm:$0xff] }
 0x537   :  { %2786 = vmatmul.msk.bf16.gmra.mxu2 %vm782_vm1, %v4341_v11 }
 0x538   :  { %2434 = vst [vmem:[#allocation5 + $0x1d0] sm:$0xff] %v2370_v17 }
 0x53a   :  { %v2160_v39 = vpop.f32.mrf.mxu2  ;;  %v2209_v61 = vpop.f32.mrf.mxu3 }
 0x53b   :  { %v2368_v24 = vmul.f32 %v3100_v53, %v2160_v39  ;;  %v2369_v25 = vmul.f32 %v3101_v5, %v2209_v61 }
 0x53d   :  { %2432 = vst [vmem:[#allocation5 + $0x1c0] sm:$0xff] %v2368_v24  ;;  %v2260_v37 = vpop.f32.mrf.mxu0 }
 0x53e   :  { %2433 = vst [vmem:[#allocation5 + $0x1c8] sm:$0xff] %v2369_v25  ;;  %v2374_v40 = vmul.f32 %v3102_v12, %v2260_v37 }
 0x540   :  { %2438 = vst [vmem:[#allocation5 + $0x1f0] sm:$0xff] %v2374_v40 }
 0x542   :  { %v2162_v44 = vpop.f32.mrf.mxu2  ;;  %v2211_v42 = vpop.f32.mrf.mxu3 }
 0x543   :  { %v2372_v7 = vmul.f32 %v3103_v41, %v2162_v44  ;;  %v2373_v36 = vmul.f32 %v3104_v54, %v2211_v42 }
 0x545   :  { %2436 = vst [vmem:[#allocation5 + $0x1e0] sm:$0xff] %v2372_v7 }
 0x546   :  { %2437 = vst [vmem:[#allocation5 + $0x1e8] sm:$0xff] %v2373_v36 }
 0x54a   :  { %v2272_v11 = vpop.f32.mrf.mxu2 }
 0x54b   :  { %v2315_v52 = vmul.f32 %v3105_v9, %v2272_v11 }
 0x54d   :  { %2379 = vst [vmem:[#allocation5 + $0x18] sm:$0xff] %v2315_v52 }
 0x552   :  { %v2274_v45 = vpop.f32.mrf.mxu2 }
 0x553   :  { %v2319_v22 = vmul.f32 %v3106_v18, %v2274_v45 }
 0x555   :  { %2383 = vst [vmem:[#allocation5 + $0x38] sm:$0xff] %v2319_v22 }
 0x55a   :  { %v2277_v62 = vpop.f32.mrf.mxu2 }
 0x55b   :  { %v2323_v56 = vmul.f32 %v3107_v63, %v2277_v62 }
 0x55d   :  { %2387 = vst [vmem:[#allocation5 + $0x58] sm:$0xff] %v2323_v56 }
 0x562   :  { %v2279_v46 = vpop.f32.mrf.mxu2 }
 0x563   :  { %v2327_v38 = vmul.f32 %v3108_v6, %v2279_v46 }
 0x565   :  { %2391 = vst [vmem:[#allocation5 + $0x78] sm:$0xff] %v2327_v38 }
 0x56a   :  { %v2282_v35 = vpop.f32.mrf.mxu2 }
 0x56b   :  { %v2331_v43 = vmul.f32 %v3109_v16, %v2282_v35 }
 0x56d   :  { %2395 = vst [vmem:[#allocation5 + $0x98] sm:$0xff] %v2331_v43 }
 0x572   :  { %v2284_v47 = vpop.f32.mrf.mxu2 }
 0x573   :  { %v2335_v26 = vmul.f32 %v3110_v29, %v2284_v47 }
 0x575   :  { %2399 = vst [vmem:[#allocation5 + $0xb8] sm:$0xff] %v2335_v26 }
 0x57a   :  { %v2287_v0 = vpop.f32.mrf.mxu2 }
 0x57b   :  { %v2339_v27 = vmul.f32 %v3111_v3, %v2287_v0 }
 0x57d   :  { %2403 = vst [vmem:[#allocation5 + $0xd8] sm:$0xff] %v2339_v27 }
 0x582   :  { %v2289_v23 = vpop.f32.mrf.mxu2 }
 0x583   :  { %v2343_v57 = vmul.f32 %v3112_v15, %v2289_v23 }
 0x585   :  { %2407 = vst [vmem:[#allocation5 + $0xf8] sm:$0xff] %v2343_v57 }
 0x58a   :  { %v2292_v14 = vpop.f32.mrf.mxu2 }
 0x58b   :  { %v2347_v33 = vmul.f32 %v3113_v20, %v2292_v14 }
 0x58d   :  { %2411 = vst [vmem:[#allocation5 + $0x118] sm:$0xff] %v2347_v33 }
 0x592   :  { %v2294_v55 = vpop.f32.mrf.mxu2 }
 0x593   :  { %v2351_v10 = vmul.f32 %v3114_v49, %v2294_v55 }
 0x595   :  { %2415 = vst [vmem:[#allocation5 + $0x138] sm:$0xff] %v2351_v10 }
 0x59a   :  { %v2297_v34 = vpop.f32.mrf.mxu2 }
 0x59b   :  { %v2355_v19 = vmul.f32 %v3115_v50, %v2297_v34 }
 0x59d   :  { %2419 = vst [vmem:[#allocation5 + $0x158] sm:$0xff] %v2355_v19 }
 0x5a2   :  { %v2299_v21 = vpop.f32.mrf.mxu2 }
 0x5a3   :  { %v2359_v28 = vmul.f32 %v3116_v60, %v2299_v21 }
 0x5a5   :  { %2423 = vst [vmem:[#allocation5 + $0x178] sm:$0xff] %v2359_v28 }
 0x5aa   :  { %v2302_v2 = vpop.f32.mrf.mxu2 }
 0x5ab   :  { %v2363_v13 = vmul.f32 %v3117_v59, %v2302_v2 }
 0x5ad   :  { %2427 = vst [vmem:[#allocation5 + $0x198] sm:$0xff] %v2363_v13 }
 0x5b2   :  { %v2304_v30 = vpop.f32.mrf.mxu2 }
 0x5b3   :  { %v2367_v48 = vmul.f32 %v3118_v58, %v2304_v30 }
 0x5b5   :  { %2431 = vst [vmem:[#allocation5 + $0x1b8] sm:$0xff] %v2367_v48 }
 0x5ba   :  { %v2307_v51 = vpop.f32.mrf.mxu2 }
 0x5bb   :  { %v2371_v4 = vmul.f32 %v3119_v8, %v2307_v51 }
 0x5bd   :  { %2435 = vst [vmem:[#allocation5 + $0x1d8] sm:$0xff] %v2371_v4 }
 0x5c2   :  { %v2309_v1 = vpop.f32.mrf.mxu2 }
 0x5c3   :  { %v2375_v32 = vmul.f32 %v3120_v31, %v2309_v1 }
 0x5c5   :  { %2439 = vst [vmem:[#allocation5 + $0x1f8] sm:$0xff] %v2375_v32 }
 0x5c6   :  { %2452 = dma.vmem_to_hbm [thread:$0]  %s2445_s25, 8192, %s2447_s3, [#allocation4], %s3174_s26, %s3174_s26, %s3175_s27  }
 0x5c7   :  { %3171 = dma.done.wait [#allocation4], 8192  }
 0x5c8   :  { %3172 = vsyncadd [#allocation4], 4294959104 }
 0x5c9   :  { %2457 = vsyncpa [#allocation3], 1 }
 0x5ca   :  { %2458 = vsyncpa [#allocation4], 1 }

</bundles_post_ra>
